<compile_context>
chip_gen: v5e
topology: v5e:2x2
jax: 0.10.0
libtpu: 0.0.40
codegen_flags: <defaults>
</compile_context>

<pallas_src>
import jax
import jax.numpy as jnp
from jax.experimental import pallas as pl
from jax.experimental.pallas import tpu as pltpu

LATENT = 12      # latent_dim / LSTM input size
HIDDEN = 12      # LSTM hidden size per direction
T = 10           # repeat([1, 10, 1]) -> sequence length
G = 32           # per-gate, per-direction lane stride (12 real + 20 zero lanes)
HW = 2 * G       # packed hidden/state width: h_f | h_b = 64 lanes
NGL = 8 * G      # packed fused gate width: 4 gates x 2 dirs x 32 = 256 lanes
XW = 32          # padded input width: 12 latent lanes + 1 "ones"/bias lane + zeros
TP = 16          # padded time (output lanes)


def decoder_kernel(x_ref, wih_ref, whh_ref, wconv_ref, bconv_ref, out_ref):
    RB = x_ref.shape[0]

    x = x_ref[...]                       # (RB, 32)   latent + ones-lane
    wih = wih_ref[...]                   # (32, 256)  fused input->gates, biases folded
    whh = whh_ref[...]                   # (64, 256)  fused hidden->gates (block-diag)
    wc_f = wconv_ref[0:1, :]             # (1, 64)    conv weights on forward lanes
    wc_b = wconv_ref[1:2, :]             # (1, 64)    conv weights on backward lanes

    # Input sequence is a constant repeat of the latent, so the input+bias gate
    # contribution is time-invariant: one fused dot for both directions.
    zx = jnp.dot(x, wih, preferred_element_type=jnp.float32)   # (RB, 256)

    # Loop-invariant 1-sublane constants (1 vreg each; no spill pressure at big RB).
    lane = jax.lax.broadcasted_iota(jnp.int32, (1, NGL), 1)
    is_g = jnp.logical_and(lane >= 4 * G, lane < 6 * G)        # tanh-gate (g) lanes
    post_mul = jnp.where(is_g, 1.0, 0.5).astype(jnp.float32)   # (1, 256)
    post_add = jnp.where(is_g, 0.0, 0.5).astype(jnp.float32)   # (1, 256)
    t_lane = jax.lax.broadcasted_iota(jnp.int32, (1, TP), 1)   # (1, 16)

    out_acc = jnp.zeros((RB, TP), jnp.float32) + bconv_ref[...]  # conv bias pre-added

    h = jnp.zeros((RB, HW), jnp.float32)   # [h_f | h_b] at 32-lane stride
    c = jnp.zeros((RB, HW), jnp.float32)

    for s in range(T):                   # static unroll (T = 10)
        # One fused (RB,64)x(64,256) recurrent dot for BOTH directions per step.
        z = jnp.dot(h, whh, preferred_element_type=jnp.float32) + zx   # (RB, 256)

        # Single EUP pass for all eight gate blocks: i/f/o columns were pre-scaled
        # by 0.5 in the packed weights, so sigmoid = 0.5*tanh(z)+0.5, g = tanh(z).
        gt = jnp.tanh(z) * post_mul + post_add
        i = gt[:, 0 * HW:1 * HW]         # (RB, 64) each: [fwd | bwd]
        f = gt[:, 1 * HW:2 * HW]
        g = gt[:, 2 * HW:3 * HW]
        o = gt[:, 3 * HW:4 * HW]
        c = f * c + i * g
        h = o * jnp.tanh(c)

        # 1x1 Conv1d over 24 channels == per-timestep dot with a length-24 weight,
        # split into forward/backward lane-masked halves, accumulated in-loop
        # (hides under later steps' MXU/EUP; no serial epilogue).
        red_f = jnp.sum(h * wc_f, axis=1, keepdims=True)       # (RB, 1)
        red_b = jnp.sum(h * wc_b, axis=1, keepdims=True)       # (RB, 1)
        m_f = (t_lane == s).astype(jnp.float32)                # fwd step s -> t = s
        m_b = (t_lane == (T - 1 - s)).astype(jnp.float32)      # bwd step s -> t = T-1-s
        out_acc = out_acc + red_f * m_f + red_b * m_b

    out_ref[...] = out_acc


def pack_params(params):
    """One-time host-side weight packing (off the per-call forward path).

    Fused gate layout (256 lanes, 32-lane stride):
      [i_f | i_b | f_f | f_b | g_f | g_b | o_f | o_b]
    i/f/o columns pre-scaled by 0.5 (sigmoid-via-tanh trick); biases folded into
    the ones-lane row of wih.  All padded lanes/rows are exactly zero.
    """
    (Wih_f, Whh_f, bih_f, bhh_f,
     Wih_b, Whh_b, bih_b, bhh_b, Wtdd, btdd) = params

    wih = jnp.zeros((XW, NGL), jnp.float32)    # (32, 256)
    whh = jnp.zeros((HW, NGL), jnp.float32)    # (64, 256), block-diagonal by direction
    dirs = [(Wih_f, Whh_f, bih_f, bhh_f), (Wih_b, Whh_b, bih_b, bhh_b)]
    for d, (Wih, Whh, bih, bhh) in enumerate(dirs):
        b = (bih + bhh).astype(jnp.float32)
        for q in range(4):                     # PyTorch gate order i, f, g, o
            scale = 1.0 if q == 2 else 0.5     # g (tanh) unscaled
            col = q * HW + d * G
            wih = wih.at[:LATENT, col:col + HIDDEN].set(
                scale * Wih[q * HIDDEN:(q + 1) * HIDDEN, :].T.astype(jnp.float32))
            wih = wih.at[LATENT, col:col + HIDDEN].set(
                scale * b[q * HIDDEN:(q + 1) * HIDDEN])
            whh = whh.at[d * G:d * G + HIDDEN, col:col + HIDDEN].set(
                scale * Whh[q * HIDDEN:(q + 1) * HIDDEN, :].T.astype(jnp.float32))

    wconv = jnp.zeros((2, HW), jnp.float32)    # row 0: fwd lanes, row 1: bwd lanes
    wconv = wconv.at[0, :HIDDEN].set(Wtdd[0, :HIDDEN, 0].astype(jnp.float32))
    wconv = wconv.at[1, G:G + HIDDEN].set(
        Wtdd[0, HIDDEN:2 * HIDDEN, 0].astype(jnp.float32))
    bconv = jnp.full((1, TP), btdd[0], jnp.float32)
    return wih, whh, wconv, bconv


def decoder_forward(x, packed):
    wih, whh, wconv, bconv = packed
    B = x.shape[0]
    assert x.shape[1] == LATENT

    # Row-block grid: batch rows map to sublanes.  Small batches run as a single
    # block; large batches split into 64-row blocks that pipeline and (on v7x)
    # shard across both TensorCores via dimension_semantics=("parallel",).
    b8 = max(8, ((B + 7) // 8) * 8)
    if b8 <= 64:
        RB = b8
        BP = b8
    else:
        RB = 64
        BP = ((b8 + RB - 1) // RB) * RB
    grid = (BP // RB,)

    x_pad = jnp.zeros((BP, XW), jnp.float32)
    x_pad = x_pad.at[:B, :LATENT].set(x.astype(jnp.float32))
    x_pad = x_pad.at[:B, LATENT].set(1.0)     # ones-lane carries the LSTM biases

    out_pad = pl.pallas_call(
        decoder_kernel,
        out_shape=jax.ShapeDtypeStruct((BP, TP), jnp.float32),
        grid=grid,
        in_specs=[
            pl.BlockSpec((RB, XW), lambda i: (i, 0)),       # x row blocks (pipelined)
            pl.BlockSpec((XW, NGL), lambda i: (0, 0)),      # wih  (VMEM resident)
            pl.BlockSpec((HW, NGL), lambda i: (0, 0)),      # whh  (VMEM resident)
            pl.BlockSpec((2, HW), lambda i: (0, 0)),        # conv weights (resident)
            pl.BlockSpec((1, TP), lambda i: (0, 0)),        # conv bias row (resident)
        ],
        out_specs=pl.BlockSpec((RB, TP), lambda i: (i, 0)),
        compiler_params=pltpu.CompilerParams(
            dimension_semantics=("parallel",)),
    )(x_pad, wih, whh, wconv, bconv)

    # (B, 10, 1) -- matches PyTorch forward output
    return out_pad[:B, :T, None]


def decoder_reference(x, params):
    """Plain-JAX reference of the PyTorch forward pass."""
    (Wih_f, Whh_f, bih_f, bhh_f,
     Wih_b, Whh_b, bih_b, bhh_b, Wtdd, btdd) = params
    B = x.shape[0]
    xs = jnp.broadcast_to(x[:, None, :], (B, T, LATENT))     # repeat([1, 10, 1])

    def run_dir(Wih, Whh, bih, bhh, reverse):
        h = jnp.zeros((B, HIDDEN), jnp.float32)
        c = jnp.zeros((B, HIDDEN), jnp.float32)
        out = jnp.zeros((B, T, HIDDEN), jnp.float32)
        order = range(T - 1, -1, -1) if reverse else range(T)
        for t in order:
            z = xs[:, t] @ Wih.T + bih + h @ Whh.T + bhh
            i = jax.nn.sigmoid(z[:, 0:HIDDEN])
            f = jax.nn.sigmoid(z[:, HIDDEN:2 * HIDDEN])
            g = jnp.tanh(z[:, 2 * HIDDEN:3 * HIDDEN])
            o = jax.nn.sigmoid(z[:, 3 * HIDDEN:4 * HIDDEN])
            c = f * c + i * g
            h = o * jnp.tanh(c)
            out = out.at[:, t].set(h)
        return out

    y_f = run_dir(Wih_f, Whh_f, bih_f, bhh_f, False)
    y_b = run_dir(Wih_b, Whh_b, bih_b, bhh_b, True)
    y = jnp.concatenate([y_f, y_b], axis=-1)                 # (B, T, 24)
    out = jnp.einsum('btc,c->bt', y, Wtdd[0, :, 0]) + btdd[0]
    return out[:, :, None]                                   # (B, T, 1)


def init_params(key):
    # Deterministic init, U(-1/sqrt(H), 1/sqrt(H)) like PyTorch defaults.
    bound = 1.0 / (HIDDEN ** 0.5)
    keys = jax.random.split(key, 10)

    def u(k, shape):
        return jax.random.uniform(k, shape, jnp.float32, -bound, bound)

    Wih_f = u(keys[0], (4 * HIDDEN, LATENT))
    Whh_f = u(keys[1], (4 * HIDDEN, HIDDEN))
    bih_f = u(keys[2], (4 * HIDDEN,))
    bhh_f = u(keys[3], (4 * HIDDEN,))
    Wih_b = u(keys[4], (4 * HIDDEN, LATENT))
    Whh_b = u(keys[5], (4 * HIDDEN, HIDDEN))
    bih_b = u(keys[6], (4 * HIDDEN,))
    bhh_b = u(keys[7], (4 * HIDDEN,))
    Wtdd = u(keys[8], (1, 2 * HIDDEN, 1))   # Conv1d(24, 1, 1) weight
    btdd = u(keys[9], (1,))                 # Conv1d bias
    return (Wih_f, Whh_f, bih_f, bhh_f,
            Wih_b, Whh_b, bih_b, bhh_b, Wtdd, btdd)


if __name__ == "__main__":
    key = jax.random.PRNGKey(0)
    kp, kx = jax.random.split(key)
    params = init_params(kp)

    B = 2
    x = jax.random.normal(kx, (B, LATENT), jnp.float32)      # latent vectors

    packed = pack_params(params)            # one-time packing, off the call path
    fwd = jax.jit(decoder_forward)
    out = jax.block_until_ready(fwd(x, packed))

    ref = decoder_reference(x, params)
    assert out.shape == (B, T, 1), out.shape
    max_err = float(jnp.max(jnp.abs(out - ref)))
    assert max_err < 1e-4, f"mismatch vs reference: {max_err}"

    print("KERNEL_OK")
</pallas_src>

<mosaic_0001>
module attributes {stable_mosaic.version = 11 : i64} {
  func.func @decoder_kernel(%arg0: i32, %arg1: memref<8x32xf32, #tpu.memory_space<vmem>>, %arg2: memref<32x256xf32, #tpu.memory_space<vmem>>, %arg3: memref<64x256xf32, #tpu.memory_space<vmem>>, %arg4: memref<2x64xf32, #tpu.memory_space<vmem>>, %arg5: memref<1x16xf32, #tpu.memory_space<vmem>>, %arg6: memref<8x16xf32, #tpu.memory_space<vmem>>) attributes {dimension_semantics = [#tpu.dimension_semantics<parallel>], iteration_bounds = array<i64: 1>, scalar_prefetch = 0 : i64, scratch_operands = 0 : i64, tpu.core_type = #tpu.core_type<tc>, window_params = [{transform_indices = @transform_0, window_bounds = array<i64: 8, 32>}, {pipeline_mode = #tpu.pipeline_mode<synchronous>, transform_indices = @transform_1, window_bounds = array<i64: 32, 256>}, {pipeline_mode = #tpu.pipeline_mode<synchronous>, transform_indices = @transform_2, window_bounds = array<i64: 64, 256>}, {pipeline_mode = #tpu.pipeline_mode<synchronous>, transform_indices = @transform_3, window_bounds = array<i64: 2, 64>}, {pipeline_mode = #tpu.pipeline_mode<synchronous>, transform_indices = @transform_4, window_bounds = array<i64: 1, 16>}, {transform_indices = @transform_5, window_bounds = array<i64: 8, 16>}]} {
    %c0 = arith.constant 0 : index
    %c0_0 = arith.constant 0 : index
    %0 = vector.load %arg1[%c0, %c0_0] : memref<8x32xf32, #tpu.memory_space<vmem>>, vector<8x32xf32>
    %c0_1 = arith.constant 0 : index
    %c0_2 = arith.constant 0 : index
    %1 = vector.load %arg2[%c0_1, %c0_2] : memref<32x256xf32, #tpu.memory_space<vmem>>, vector<32x256xf32>
    %c0_3 = arith.constant 0 : index
    %c0_4 = arith.constant 0 : index
    %2 = vector.load %arg3[%c0_3, %c0_4] : memref<64x256xf32, #tpu.memory_space<vmem>>, vector<64x256xf32>
    %c0_5 = arith.constant 0 : index
    %c0_6 = arith.constant 0 : index
    %3 = vector.load %arg4[%c0_5, %c0_6] : memref<2x64xf32, #tpu.memory_space<vmem>>, vector<1x64xf32>
    %c1 = arith.constant 1 : index
    %c0_7 = arith.constant 0 : index
    %4 = vector.load %arg4[%c1, %c0_7] : memref<2x64xf32, #tpu.memory_space<vmem>>, vector<1x64xf32>
    %cst = arith.constant dense<0.000000e+00> : vector<8x256xf32>
    %5 = tpu.matmul %0, %1, %cst {dimension_numbers = #tpu.dot_dimension_numbers<[1], [0], [0], [1], [0, 0, 1, 1], [], []>} : vector<8x32xf32>, vector<32x256xf32>, vector<8x256xf32> -> vector<8x256xf32>
    %6 = tpu.iota {dimensions = array<i32: 1>} : vector<1x256xi32>
    %c128_i32 = arith.constant 128 : i32
    %7 = vector.broadcast %c128_i32 : i32 to vector<1x256xi32>
    %8 = arith.cmpi sge, %6, %7 : vector<1x256xi32>
    %c192_i32 = arith.constant 192 : i32
    %9 = vector.broadcast %c192_i32 : i32 to vector<1x256xi32>
    %10 = arith.cmpi slt, %6, %9 : vector<1x256xi32>
    %11 = arith.andi %8, %10 : vector<1x256xi1>
    %cst_8 = arith.constant 1.000000e+00 : f32
    %cst_9 = arith.constant 5.000000e-01 : f32
    %12 = vector.broadcast %cst_8 : f32 to vector<1x256xf32>
    %13 = vector.broadcast %cst_9 : f32 to vector<1x256xf32>
    %14 = arith.select %11, %12, %13 : vector<1x256xi1>, vector<1x256xf32>
    %cst_10 = arith.constant 0.000000e+00 : f32
    %cst_11 = arith.constant 5.000000e-01 : f32
    %15 = vector.broadcast %cst_10 : f32 to vector<1x256xf32>
    %16 = vector.broadcast %cst_11 : f32 to vector<1x256xf32>
    %17 = arith.select %11, %15, %16 : vector<1x256xi1>, vector<1x256xf32>
    %18 = tpu.iota {dimensions = array<i32: 1>} : vector<1x16xi32>
    %cst_12 = arith.constant 0.000000e+00 : f32
    %19 = vector.broadcast %cst_12 : f32 to vector<8x16xf32>
    %c0_13 = arith.constant 0 : index
    %c0_14 = arith.constant 0 : index
    %20 = vector.load %arg5[%c0_13, %c0_14] : memref<1x16xf32, #tpu.memory_space<vmem>>, vector<1x16xf32>
    %21 = vector.broadcast %20 : vector<1x16xf32> to vector<8x16xf32>
    %22 = arith.addf %19, %21 : vector<8x16xf32>
    %cst_15 = arith.constant 0.000000e+00 : f32
    %23 = vector.broadcast %cst_15 : f32 to vector<8x64xf32>
    %cst_16 = arith.constant 0.000000e+00 : f32
    %24 = vector.broadcast %cst_16 : f32 to vector<8x64xf32>
    %cst_17 = arith.constant dense<0.000000e+00> : vector<8x256xf32>
    %25 = tpu.matmul %23, %2, %cst_17 {dimension_numbers = #tpu.dot_dimension_numbers<[1], [0], [0], [1], [0, 0, 1, 1], [], []>} : vector<8x64xf32>, vector<64x256xf32>, vector<8x256xf32> -> vector<8x256xf32>
    %26 = arith.addf %25, %5 : vector<8x256xf32>
    %27 = math.tanh %26 : vector<8x256xf32>
    %28 = vector.broadcast %14 : vector<1x256xf32> to vector<8x256xf32>
    %29 = arith.mulf %27, %28 : vector<8x256xf32>
    %30 = vector.broadcast %17 : vector<1x256xf32> to vector<8x256xf32>
    %31 = arith.addf %29, %30 : vector<8x256xf32>
    %32 = vector.extract_strided_slice %31 {offsets = [0, 0], sizes = [8, 64], strides = [1, 1]} : vector<8x256xf32> to vector<8x64xf32>
    %33 = vector.extract_strided_slice %31 {offsets = [0, 64], sizes = [8, 64], strides = [1, 1]} : vector<8x256xf32> to vector<8x64xf32>
    %34 = vector.extract_strided_slice %31 {offsets = [0, 128], sizes = [8, 64], strides = [1, 1]} : vector<8x256xf32> to vector<8x64xf32>
    %35 = vector.extract_strided_slice %31 {offsets = [0, 192], sizes = [8, 64], strides = [1, 1]} : vector<8x256xf32> to vector<8x64xf32>
    %36 = arith.mulf %33, %24 : vector<8x64xf32>
    %37 = arith.mulf %32, %34 : vector<8x64xf32>
    %38 = arith.addf %36, %37 : vector<8x64xf32>
    %39 = math.tanh %38 : vector<8x64xf32>
    %40 = arith.mulf %35, %39 : vector<8x64xf32>
    %41 = vector.broadcast %3 : vector<1x64xf32> to vector<8x64xf32>
    %42 = arith.mulf %40, %41 : vector<8x64xf32>
    %cst_18 = arith.constant dense<0.000000e+00> : vector<8xf32>
    %43 = vector.multi_reduction <add>, %42, %cst_18 [1] : vector<8x64xf32> to vector<8xf32>
    %44 = vector.shape_cast %43 : vector<8xf32> to vector<8x1xf32>
    %45 = vector.broadcast %4 : vector<1x64xf32> to vector<8x64xf32>
    %46 = arith.mulf %40, %45 : vector<8x64xf32>
    %cst_19 = arith.constant dense<0.000000e+00> : vector<8xf32>
    %47 = vector.multi_reduction <add>, %46, %cst_19 [1] : vector<8x64xf32> to vector<8xf32>
    %48 = vector.shape_cast %47 : vector<8xf32> to vector<8x1xf32>
    %c0_i32 = arith.constant 0 : i32
    %49 = vector.broadcast %c0_i32 : i32 to vector<1x16xi32>
    %50 = arith.cmpi eq, %18, %49 : vector<1x16xi32>
    %51 = arith.extui %50 : vector<1x16xi1> to vector<1x16xi32>
    %52 = arith.sitofp %51 : vector<1x16xi32> to vector<1x16xf32>
    %c9_i32 = arith.constant 9 : i32
    %53 = vector.broadcast %c9_i32 : i32 to vector<1x16xi32>
    %54 = arith.cmpi eq, %18, %53 : vector<1x16xi32>
    %55 = arith.extui %54 : vector<1x16xi1> to vector<1x16xi32>
    %56 = arith.sitofp %55 : vector<1x16xi32> to vector<1x16xf32>
    %57 = vector.broadcast %44 : vector<8x1xf32> to vector<8x16xf32>
    %58 = vector.broadcast %52 : vector<1x16xf32> to vector<8x16xf32>
    %59 = arith.mulf %57, %58 : vector<8x16xf32>
    %60 = arith.addf %22, %59 : vector<8x16xf32>
    %61 = vector.broadcast %48 : vector<8x1xf32> to vector<8x16xf32>
    %62 = vector.broadcast %56 : vector<1x16xf32> to vector<8x16xf32>
    %63 = arith.mulf %61, %62 : vector<8x16xf32>
    %64 = arith.addf %60, %63 : vector<8x16xf32>
    %cst_20 = arith.constant dense<0.000000e+00> : vector<8x256xf32>
    %65 = tpu.matmul %40, %2, %cst_20 {dimension_numbers = #tpu.dot_dimension_numbers<[1], [0], [0], [1], [0, 0, 1, 1], [], []>} : vector<8x64xf32>, vector<64x256xf32>, vector<8x256xf32> -> vector<8x256xf32>
    %66 = arith.addf %65, %5 : vector<8x256xf32>
    %67 = math.tanh %66 : vector<8x256xf32>
    %68 = vector.broadcast %14 : vector<1x256xf32> to vector<8x256xf32>
    %69 = arith.mulf %67, %68 : vector<8x256xf32>
    %70 = vector.broadcast %17 : vector<1x256xf32> to vector<8x256xf32>
    %71 = arith.addf %69, %70 : vector<8x256xf32>
    %72 = vector.extract_strided_slice %71 {offsets = [0, 0], sizes = [8, 64], strides = [1, 1]} : vector<8x256xf32> to vector<8x64xf32>
    %73 = vector.extract_strided_slice %71 {offsets = [0, 64], sizes = [8, 64], strides = [1, 1]} : vector<8x256xf32> to vector<8x64xf32>
    %74 = vector.extract_strided_slice %71 {offsets = [0, 128], sizes = [8, 64], strides = [1, 1]} : vector<8x256xf32> to vector<8x64xf32>
    %75 = vector.extract_strided_slice %71 {offsets = [0, 192], sizes = [8, 64], strides = [1, 1]} : vector<8x256xf32> to vector<8x64xf32>
    %76 = arith.mulf %73, %38 : vector<8x64xf32>
    %77 = arith.mulf %72, %74 : vector<8x64xf32>
    %78 = arith.addf %76, %77 : vector<8x64xf32>
    %79 = math.tanh %78 : vector<8x64xf32>
    %80 = arith.mulf %75, %79 : vector<8x64xf32>
    %81 = vector.broadcast %3 : vector<1x64xf32> to vector<8x64xf32>
    %82 = arith.mulf %80, %81 : vector<8x64xf32>
    %cst_21 = arith.constant dense<0.000000e+00> : vector<8xf32>
    %83 = vector.multi_reduction <add>, %82, %cst_21 [1] : vector<8x64xf32> to vector<8xf32>
    %84 = vector.shape_cast %83 : vector<8xf32> to vector<8x1xf32>
    %85 = vector.broadcast %4 : vector<1x64xf32> to vector<8x64xf32>
    %86 = arith.mulf %80, %85 : vector<8x64xf32>
    %cst_22 = arith.constant dense<0.000000e+00> : vector<8xf32>
    %87 = vector.multi_reduction <add>, %86, %cst_22 [1] : vector<8x64xf32> to vector<8xf32>
    %88 = vector.shape_cast %87 : vector<8xf32> to vector<8x1xf32>
    %c1_i32 = arith.constant 1 : i32
    %89 = vector.broadcast %c1_i32 : i32 to vector<1x16xi32>
    %90 = arith.cmpi eq, %18, %89 : vector<1x16xi32>
    %91 = arith.extui %90 : vector<1x16xi1> to vector<1x16xi32>
    %92 = arith.sitofp %91 : vector<1x16xi32> to vector<1x16xf32>
    %c8_i32 = arith.constant 8 : i32
    %93 = vector.broadcast %c8_i32 : i32 to vector<1x16xi32>
    %94 = arith.cmpi eq, %18, %93 : vector<1x16xi32>
    %95 = arith.extui %94 : vector<1x16xi1> to vector<1x16xi32>
    %96 = arith.sitofp %95 : vector<1x16xi32> to vector<1x16xf32>
    %97 = vector.broadcast %84 : vector<8x1xf32> to vector<8x16xf32>
    %98 = vector.broadcast %92 : vector<1x16xf32> to vector<8x16xf32>
    %99 = arith.mulf %97, %98 : vector<8x16xf32>
    %100 = arith.addf %64, %99 : vector<8x16xf32>
    %101 = vector.broadcast %88 : vector<8x1xf32> to vector<8x16xf32>
    %102 = vector.broadcast %96 : vector<1x16xf32> to vector<8x16xf32>
    %103 = arith.mulf %101, %102 : vector<8x16xf32>
    %104 = arith.addf %100, %103 : vector<8x16xf32>
    %cst_23 = arith.constant dense<0.000000e+00> : vector<8x256xf32>
    %105 = tpu.matmul %80, %2, %cst_23 {dimension_numbers = #tpu.dot_dimension_numbers<[1], [0], [0], [1], [0, 0, 1, 1], [], []>} : vector<8x64xf32>, vector<64x256xf32>, vector<8x256xf32> -> vector<8x256xf32>
    %106 = arith.addf %105, %5 : vector<8x256xf32>
    %107 = math.tanh %106 : vector<8x256xf32>
    %108 = vector.broadcast %14 : vector<1x256xf32> to vector<8x256xf32>
    %109 = arith.mulf %107, %108 : vector<8x256xf32>
    %110 = vector.broadcast %17 : vector<1x256xf32> to vector<8x256xf32>
    %111 = arith.addf %109, %110 : vector<8x256xf32>
    %112 = vector.extract_strided_slice %111 {offsets = [0, 0], sizes = [8, 64], strides = [1, 1]} : vector<8x256xf32> to vector<8x64xf32>
    %113 = vector.extract_strided_slice %111 {offsets = [0, 64], sizes = [8, 64], strides = [1, 1]} : vector<8x256xf32> to vector<8x64xf32>
    %114 = vector.extract_strided_slice %111 {offsets = [0, 128], sizes = [8, 64], strides = [1, 1]} : vector<8x256xf32> to vector<8x64xf32>
    %115 = vector.extract_strided_slice %111 {offsets = [0, 192], sizes = [8, 64], strides = [1, 1]} : vector<8x256xf32> to vector<8x64xf32>
    %116 = arith.mulf %113, %78 : vector<8x64xf32>
    %117 = arith.mulf %112, %114 : vector<8x64xf32>
    %118 = arith.addf %116, %117 : vector<8x64xf32>
    %119 = math.tanh %118 : vector<8x64xf32>
    %120 = arith.mulf %115, %119 : vector<8x64xf32>
    %121 = vector.broadcast %3 : vector<1x64xf32> to vector<8x64xf32>
    %122 = arith.mulf %120, %121 : vector<8x64xf32>
    %cst_24 = arith.constant dense<0.000000e+00> : vector<8xf32>
    %123 = vector.multi_reduction <add>, %122, %cst_24 [1] : vector<8x64xf32> to vector<8xf32>
    %124 = vector.shape_cast %123 : vector<8xf32> to vector<8x1xf32>
    %125 = vector.broadcast %4 : vector<1x64xf32> to vector<8x64xf32>
    %126 = arith.mulf %120, %125 : vector<8x64xf32>
    %cst_25 = arith.constant dense<0.000000e+00> : vector<8xf32>
    %127 = vector.multi_reduction <add>, %126, %cst_25 [1] : vector<8x64xf32> to vector<8xf32>
    %128 = vector.shape_cast %127 : vector<8xf32> to vector<8x1xf32>
    %c2_i32 = arith.constant 2 : i32
    %129 = vector.broadcast %c2_i32 : i32 to vector<1x16xi32>
    %130 = arith.cmpi eq, %18, %129 : vector<1x16xi32>
    %131 = arith.extui %130 : vector<1x16xi1> to vector<1x16xi32>
    %132 = arith.sitofp %131 : vector<1x16xi32> to vector<1x16xf32>
    %c7_i32 = arith.constant 7 : i32
    %133 = vector.broadcast %c7_i32 : i32 to vector<1x16xi32>
    %134 = arith.cmpi eq, %18, %133 : vector<1x16xi32>
    %135 = arith.extui %134 : vector<1x16xi1> to vector<1x16xi32>
    %136 = arith.sitofp %135 : vector<1x16xi32> to vector<1x16xf32>
    %137 = vector.broadcast %124 : vector<8x1xf32> to vector<8x16xf32>
    %138 = vector.broadcast %132 : vector<1x16xf32> to vector<8x16xf32>
    %139 = arith.mulf %137, %138 : vector<8x16xf32>
    %140 = arith.addf %104, %139 : vector<8x16xf32>
    %141 = vector.broadcast %128 : vector<8x1xf32> to vector<8x16xf32>
    %142 = vector.broadcast %136 : vector<1x16xf32> to vector<8x16xf32>
    %143 = arith.mulf %141, %142 : vector<8x16xf32>
    %144 = arith.addf %140, %143 : vector<8x16xf32>
    %cst_26 = arith.constant dense<0.000000e+00> : vector<8x256xf32>
    %145 = tpu.matmul %120, %2, %cst_26 {dimension_numbers = #tpu.dot_dimension_numbers<[1], [0], [0], [1], [0, 0, 1, 1], [], []>} : vector<8x64xf32>, vector<64x256xf32>, vector<8x256xf32> -> vector<8x256xf32>
    %146 = arith.addf %145, %5 : vector<8x256xf32>
    %147 = math.tanh %146 : vector<8x256xf32>
    %148 = vector.broadcast %14 : vector<1x256xf32> to vector<8x256xf32>
    %149 = arith.mulf %147, %148 : vector<8x256xf32>
    %150 = vector.broadcast %17 : vector<1x256xf32> to vector<8x256xf32>
    %151 = arith.addf %149, %150 : vector<8x256xf32>
    %152 = vector.extract_strided_slice %151 {offsets = [0, 0], sizes = [8, 64], strides = [1, 1]} : vector<8x256xf32> to vector<8x64xf32>
    %153 = vector.extract_strided_slice %151 {offsets = [0, 64], sizes = [8, 64], strides = [1, 1]} : vector<8x256xf32> to vector<8x64xf32>
    %154 = vector.extract_strided_slice %151 {offsets = [0, 128], sizes = [8, 64], strides = [1, 1]} : vector<8x256xf32> to vector<8x64xf32>
    %155 = vector.extract_strided_slice %151 {offsets = [0, 192], sizes = [8, 64], strides = [1, 1]} : vector<8x256xf32> to vector<8x64xf32>
    %156 = arith.mulf %153, %118 : vector<8x64xf32>
    %157 = arith.mulf %152, %154 : vector<8x64xf32>
    %158 = arith.addf %156, %157 : vector<8x64xf32>
    %159 = math.tanh %158 : vector<8x64xf32>
    %160 = arith.mulf %155, %159 : vector<8x64xf32>
    %161 = vector.broadcast %3 : vector<1x64xf32> to vector<8x64xf32>
    %162 = arith.mulf %160, %161 : vector<8x64xf32>
    %cst_27 = arith.constant dense<0.000000e+00> : vector<8xf32>
    %163 = vector.multi_reduction <add>, %162, %cst_27 [1] : vector<8x64xf32> to vector<8xf32>
    %164 = vector.shape_cast %163 : vector<8xf32> to vector<8x1xf32>
    %165 = vector.broadcast %4 : vector<1x64xf32> to vector<8x64xf32>
    %166 = arith.mulf %160, %165 : vector<8x64xf32>
    %cst_28 = arith.constant dense<0.000000e+00> : vector<8xf32>
    %167 = vector.multi_reduction <add>, %166, %cst_28 [1] : vector<8x64xf32> to vector<8xf32>
    %168 = vector.shape_cast %167 : vector<8xf32> to vector<8x1xf32>
    %c3_i32 = arith.constant 3 : i32
    %169 = vector.broadcast %c3_i32 : i32 to vector<1x16xi32>
    %170 = arith.cmpi eq, %18, %169 : vector<1x16xi32>
    %171 = arith.extui %170 : vector<1x16xi1> to vector<1x16xi32>
    %172 = arith.sitofp %171 : vector<1x16xi32> to vector<1x16xf32>
    %c6_i32 = arith.constant 6 : i32
    %173 = vector.broadcast %c6_i32 : i32 to vector<1x16xi32>
    %174 = arith.cmpi eq, %18, %173 : vector<1x16xi32>
    %175 = arith.extui %174 : vector<1x16xi1> to vector<1x16xi32>
    %176 = arith.sitofp %175 : vector<1x16xi32> to vector<1x16xf32>
    %177 = vector.broadcast %164 : vector<8x1xf32> to vector<8x16xf32>
    %178 = vector.broadcast %172 : vector<1x16xf32> to vector<8x16xf32>
    %179 = arith.mulf %177, %178 : vector<8x16xf32>
    %180 = arith.addf %144, %179 : vector<8x16xf32>
    %181 = vector.broadcast %168 : vector<8x1xf32> to vector<8x16xf32>
    %182 = vector.broadcast %176 : vector<1x16xf32> to vector<8x16xf32>
    %183 = arith.mulf %181, %182 : vector<8x16xf32>
    %184 = arith.addf %180, %183 : vector<8x16xf32>
    %cst_29 = arith.constant dense<0.000000e+00> : vector<8x256xf32>
    %185 = tpu.matmul %160, %2, %cst_29 {dimension_numbers = #tpu.dot_dimension_numbers<[1], [0], [0], [1], [0, 0, 1, 1], [], []>} : vector<8x64xf32>, vector<64x256xf32>, vector<8x256xf32> -> vector<8x256xf32>
    %186 = arith.addf %185, %5 : vector<8x256xf32>
    %187 = math.tanh %186 : vector<8x256xf32>
    %188 = vector.broadcast %14 : vector<1x256xf32> to vector<8x256xf32>
    %189 = arith.mulf %187, %188 : vector<8x256xf32>
    %190 = vector.broadcast %17 : vector<1x256xf32> to vector<8x256xf32>
    %191 = arith.addf %189, %190 : vector<8x256xf32>
    %192 = vector.extract_strided_slice %191 {offsets = [0, 0], sizes = [8, 64], strides = [1, 1]} : vector<8x256xf32> to vector<8x64xf32>
    %193 = vector.extract_strided_slice %191 {offsets = [0, 64], sizes = [8, 64], strides = [1, 1]} : vector<8x256xf32> to vector<8x64xf32>
    %194 = vector.extract_strided_slice %191 {offsets = [0, 128], sizes = [8, 64], strides = [1, 1]} : vector<8x256xf32> to vector<8x64xf32>
    %195 = vector.extract_strided_slice %191 {offsets = [0, 192], sizes = [8, 64], strides = [1, 1]} : vector<8x256xf32> to vector<8x64xf32>
    %196 = arith.mulf %193, %158 : vector<8x64xf32>
    %197 = arith.mulf %192, %194 : vector<8x64xf32>
    %198 = arith.addf %196, %197 : vector<8x64xf32>
    %199 = math.tanh %198 : vector<8x64xf32>
    %200 = arith.mulf %195, %199 : vector<8x64xf32>
    %201 = vector.broadcast %3 : vector<1x64xf32> to vector<8x64xf32>
    %202 = arith.mulf %200, %201 : vector<8x64xf32>
    %cst_30 = arith.constant dense<0.000000e+00> : vector<8xf32>
    %203 = vector.multi_reduction <add>, %202, %cst_30 [1] : vector<8x64xf32> to vector<8xf32>
    %204 = vector.shape_cast %203 : vector<8xf32> to vector<8x1xf32>
    %205 = vector.broadcast %4 : vector<1x64xf32> to vector<8x64xf32>
    %206 = arith.mulf %200, %205 : vector<8x64xf32>
    %cst_31 = arith.constant dense<0.000000e+00> : vector<8xf32>
    %207 = vector.multi_reduction <add>, %206, %cst_31 [1] : vector<8x64xf32> to vector<8xf32>
    %208 = vector.shape_cast %207 : vector<8xf32> to vector<8x1xf32>
    %c4_i32 = arith.constant 4 : i32
    %209 = vector.broadcast %c4_i32 : i32 to vector<1x16xi32>
    %210 = arith.cmpi eq, %18, %209 : vector<1x16xi32>
    %211 = arith.extui %210 : vector<1x16xi1> to vector<1x16xi32>
    %212 = arith.sitofp %211 : vector<1x16xi32> to vector<1x16xf32>
    %c5_i32 = arith.constant 5 : i32
    %213 = vector.broadcast %c5_i32 : i32 to vector<1x16xi32>
    %214 = arith.cmpi eq, %18, %213 : vector<1x16xi32>
    %215 = arith.extui %214 : vector<1x16xi1> to vector<1x16xi32>
    %216 = arith.sitofp %215 : vector<1x16xi32> to vector<1x16xf32>
    %217 = vector.broadcast %204 : vector<8x1xf32> to vector<8x16xf32>
    %218 = vector.broadcast %212 : vector<1x16xf32> to vector<8x16xf32>
    %219 = arith.mulf %217, %218 : vector<8x16xf32>
    %220 = arith.addf %184, %219 : vector<8x16xf32>
    %221 = vector.broadcast %208 : vector<8x1xf32> to vector<8x16xf32>
    %222 = vector.broadcast %216 : vector<1x16xf32> to vector<8x16xf32>
    %223 = arith.mulf %221, %222 : vector<8x16xf32>
    %224 = arith.addf %220, %223 : vector<8x16xf32>
    %cst_32 = arith.constant dense<0.000000e+00> : vector<8x256xf32>
    %225 = tpu.matmul %200, %2, %cst_32 {dimension_numbers = #tpu.dot_dimension_numbers<[1], [0], [0], [1], [0, 0, 1, 1], [], []>} : vector<8x64xf32>, vector<64x256xf32>, vector<8x256xf32> -> vector<8x256xf32>
    %226 = arith.addf %225, %5 : vector<8x256xf32>
    %227 = math.tanh %226 : vector<8x256xf32>
    %228 = vector.broadcast %14 : vector<1x256xf32> to vector<8x256xf32>
    %229 = arith.mulf %227, %228 : vector<8x256xf32>
    %230 = vector.broadcast %17 : vector<1x256xf32> to vector<8x256xf32>
    %231 = arith.addf %229, %230 : vector<8x256xf32>
    %232 = vector.extract_strided_slice %231 {offsets = [0, 0], sizes = [8, 64], strides = [1, 1]} : vector<8x256xf32> to vector<8x64xf32>
    %233 = vector.extract_strided_slice %231 {offsets = [0, 64], sizes = [8, 64], strides = [1, 1]} : vector<8x256xf32> to vector<8x64xf32>
    %234 = vector.extract_strided_slice %231 {offsets = [0, 128], sizes = [8, 64], strides = [1, 1]} : vector<8x256xf32> to vector<8x64xf32>
    %235 = vector.extract_strided_slice %231 {offsets = [0, 192], sizes = [8, 64], strides = [1, 1]} : vector<8x256xf32> to vector<8x64xf32>
    %236 = arith.mulf %233, %198 : vector<8x64xf32>
    %237 = arith.mulf %232, %234 : vector<8x64xf32>
    %238 = arith.addf %236, %237 : vector<8x64xf32>
    %239 = math.tanh %238 : vector<8x64xf32>
    %240 = arith.mulf %235, %239 : vector<8x64xf32>
    %241 = vector.broadcast %3 : vector<1x64xf32> to vector<8x64xf32>
    %242 = arith.mulf %240, %241 : vector<8x64xf32>
    %cst_33 = arith.constant dense<0.000000e+00> : vector<8xf32>
    %243 = vector.multi_reduction <add>, %242, %cst_33 [1] : vector<8x64xf32> to vector<8xf32>
    %244 = vector.shape_cast %243 : vector<8xf32> to vector<8x1xf32>
    %245 = vector.broadcast %4 : vector<1x64xf32> to vector<8x64xf32>
    %246 = arith.mulf %240, %245 : vector<8x64xf32>
    %cst_34 = arith.constant dense<0.000000e+00> : vector<8xf32>
    %247 = vector.multi_reduction <add>, %246, %cst_34 [1] : vector<8x64xf32> to vector<8xf32>
    %248 = vector.shape_cast %247 : vector<8xf32> to vector<8x1xf32>
    %c5_i32_35 = arith.constant 5 : i32
    %249 = vector.broadcast %c5_i32_35 : i32 to vector<1x16xi32>
    %250 = arith.cmpi eq, %18, %249 : vector<1x16xi32>
    %251 = arith.extui %250 : vector<1x16xi1> to vector<1x16xi32>
    %252 = arith.sitofp %251 : vector<1x16xi32> to vector<1x16xf32>
    %c4_i32_36 = arith.constant 4 : i32
    %253 = vector.broadcast %c4_i32_36 : i32 to vector<1x16xi32>
    %254 = arith.cmpi eq, %18, %253 : vector<1x16xi32>
    %255 = arith.extui %254 : vector<1x16xi1> to vector<1x16xi32>
    %256 = arith.sitofp %255 : vector<1x16xi32> to vector<1x16xf32>
    %257 = vector.broadcast %244 : vector<8x1xf32> to vector<8x16xf32>
    %258 = vector.broadcast %252 : vector<1x16xf32> to vector<8x16xf32>
    %259 = arith.mulf %257, %258 : vector<8x16xf32>
    %260 = arith.addf %224, %259 : vector<8x16xf32>
    %261 = vector.broadcast %248 : vector<8x1xf32> to vector<8x16xf32>
    %262 = vector.broadcast %256 : vector<1x16xf32> to vector<8x16xf32>
    %263 = arith.mulf %261, %262 : vector<8x16xf32>
    %264 = arith.addf %260, %263 : vector<8x16xf32>
    %cst_37 = arith.constant dense<0.000000e+00> : vector<8x256xf32>
    %265 = tpu.matmul %240, %2, %cst_37 {dimension_numbers = #tpu.dot_dimension_numbers<[1], [0], [0], [1], [0, 0, 1, 1], [], []>} : vector<8x64xf32>, vector<64x256xf32>, vector<8x256xf32> -> vector<8x256xf32>
    %266 = arith.addf %265, %5 : vector<8x256xf32>
    %267 = math.tanh %266 : vector<8x256xf32>
    %268 = vector.broadcast %14 : vector<1x256xf32> to vector<8x256xf32>
    %269 = arith.mulf %267, %268 : vector<8x256xf32>
    %270 = vector.broadcast %17 : vector<1x256xf32> to vector<8x256xf32>
    %271 = arith.addf %269, %270 : vector<8x256xf32>
    %272 = vector.extract_strided_slice %271 {offsets = [0, 0], sizes = [8, 64], strides = [1, 1]} : vector<8x256xf32> to vector<8x64xf32>
    %273 = vector.extract_strided_slice %271 {offsets = [0, 64], sizes = [8, 64], strides = [1, 1]} : vector<8x256xf32> to vector<8x64xf32>
    %274 = vector.extract_strided_slice %271 {offsets = [0, 128], sizes = [8, 64], strides = [1, 1]} : vector<8x256xf32> to vector<8x64xf32>
    %275 = vector.extract_strided_slice %271 {offsets = [0, 192], sizes = [8, 64], strides = [1, 1]} : vector<8x256xf32> to vector<8x64xf32>
    %276 = arith.mulf %273, %238 : vector<8x64xf32>
    %277 = arith.mulf %272, %274 : vector<8x64xf32>
    %278 = arith.addf %276, %277 : vector<8x64xf32>
    %279 = math.tanh %278 : vector<8x64xf32>
    %280 = arith.mulf %275, %279 : vector<8x64xf32>
    %281 = vector.broadcast %3 : vector<1x64xf32> to vector<8x64xf32>
    %282 = arith.mulf %280, %281 : vector<8x64xf32>
    %cst_38 = arith.constant dense<0.000000e+00> : vector<8xf32>
    %283 = vector.multi_reduction <add>, %282, %cst_38 [1] : vector<8x64xf32> to vector<8xf32>
    %284 = vector.shape_cast %283 : vector<8xf32> to vector<8x1xf32>
    %285 = vector.broadcast %4 : vector<1x64xf32> to vector<8x64xf32>
    %286 = arith.mulf %280, %285 : vector<8x64xf32>
    %cst_39 = arith.constant dense<0.000000e+00> : vector<8xf32>
    %287 = vector.multi_reduction <add>, %286, %cst_39 [1] : vector<8x64xf32> to vector<8xf32>
    %288 = vector.shape_cast %287 : vector<8xf32> to vector<8x1xf32>
    %c6_i32_40 = arith.constant 6 : i32
    %289 = vector.broadcast %c6_i32_40 : i32 to vector<1x16xi32>
    %290 = arith.cmpi eq, %18, %289 : vector<1x16xi32>
    %291 = arith.extui %290 : vector<1x16xi1> to vector<1x16xi32>
    %292 = arith.sitofp %291 : vector<1x16xi32> to vector<1x16xf32>
    %c3_i32_41 = arith.constant 3 : i32
    %293 = vector.broadcast %c3_i32_41 : i32 to vector<1x16xi32>
    %294 = arith.cmpi eq, %18, %293 : vector<1x16xi32>
    %295 = arith.extui %294 : vector<1x16xi1> to vector<1x16xi32>
    %296 = arith.sitofp %295 : vector<1x16xi32> to vector<1x16xf32>
    %297 = vector.broadcast %284 : vector<8x1xf32> to vector<8x16xf32>
    %298 = vector.broadcast %292 : vector<1x16xf32> to vector<8x16xf32>
    %299 = arith.mulf %297, %298 : vector<8x16xf32>
    %300 = arith.addf %264, %299 : vector<8x16xf32>
    %301 = vector.broadcast %288 : vector<8x1xf32> to vector<8x16xf32>
    %302 = vector.broadcast %296 : vector<1x16xf32> to vector<8x16xf32>
    %303 = arith.mulf %301, %302 : vector<8x16xf32>
    %304 = arith.addf %300, %303 : vector<8x16xf32>
    %cst_42 = arith.constant dense<0.000000e+00> : vector<8x256xf32>
    %305 = tpu.matmul %280, %2, %cst_42 {dimension_numbers = #tpu.dot_dimension_numbers<[1], [0], [0], [1], [0, 0, 1, 1], [], []>} : vector<8x64xf32>, vector<64x256xf32>, vector<8x256xf32> -> vector<8x256xf32>
    %306 = arith.addf %305, %5 : vector<8x256xf32>
    %307 = math.tanh %306 : vector<8x256xf32>
    %308 = vector.broadcast %14 : vector<1x256xf32> to vector<8x256xf32>
    %309 = arith.mulf %307, %308 : vector<8x256xf32>
    %310 = vector.broadcast %17 : vector<1x256xf32> to vector<8x256xf32>
    %311 = arith.addf %309, %310 : vector<8x256xf32>
    %312 = vector.extract_strided_slice %311 {offsets = [0, 0], sizes = [8, 64], strides = [1, 1]} : vector<8x256xf32> to vector<8x64xf32>
    %313 = vector.extract_strided_slice %311 {offsets = [0, 64], sizes = [8, 64], strides = [1, 1]} : vector<8x256xf32> to vector<8x64xf32>
    %314 = vector.extract_strided_slice %311 {offsets = [0, 128], sizes = [8, 64], strides = [1, 1]} : vector<8x256xf32> to vector<8x64xf32>
    %315 = vector.extract_strided_slice %311 {offsets = [0, 192], sizes = [8, 64], strides = [1, 1]} : vector<8x256xf32> to vector<8x64xf32>
    %316 = arith.mulf %313, %278 : vector<8x64xf32>
    %317 = arith.mulf %312, %314 : vector<8x64xf32>
    %318 = arith.addf %316, %317 : vector<8x64xf32>
    %319 = math.tanh %318 : vector<8x64xf32>
    %320 = arith.mulf %315, %319 : vector<8x64xf32>
    %321 = vector.broadcast %3 : vector<1x64xf32> to vector<8x64xf32>
    %322 = arith.mulf %320, %321 : vector<8x64xf32>
    %cst_43 = arith.constant dense<0.000000e+00> : vector<8xf32>
    %323 = vector.multi_reduction <add>, %322, %cst_43 [1] : vector<8x64xf32> to vector<8xf32>
    %324 = vector.shape_cast %323 : vector<8xf32> to vector<8x1xf32>
    %325 = vector.broadcast %4 : vector<1x64xf32> to vector<8x64xf32>
    %326 = arith.mulf %320, %325 : vector<8x64xf32>
    %cst_44 = arith.constant dense<0.000000e+00> : vector<8xf32>
    %327 = vector.multi_reduction <add>, %326, %cst_44 [1] : vector<8x64xf32> to vector<8xf32>
    %328 = vector.shape_cast %327 : vector<8xf32> to vector<8x1xf32>
    %c7_i32_45 = arith.constant 7 : i32
    %329 = vector.broadcast %c7_i32_45 : i32 to vector<1x16xi32>
    %330 = arith.cmpi eq, %18, %329 : vector<1x16xi32>
    %331 = arith.extui %330 : vector<1x16xi1> to vector<1x16xi32>
    %332 = arith.sitofp %331 : vector<1x16xi32> to vector<1x16xf32>
    %c2_i32_46 = arith.constant 2 : i32
    %333 = vector.broadcast %c2_i32_46 : i32 to vector<1x16xi32>
    %334 = arith.cmpi eq, %18, %333 : vector<1x16xi32>
    %335 = arith.extui %334 : vector<1x16xi1> to vector<1x16xi32>
    %336 = arith.sitofp %335 : vector<1x16xi32> to vector<1x16xf32>
    %337 = vector.broadcast %324 : vector<8x1xf32> to vector<8x16xf32>
    %338 = vector.broadcast %332 : vector<1x16xf32> to vector<8x16xf32>
    %339 = arith.mulf %337, %338 : vector<8x16xf32>
    %340 = arith.addf %304, %339 : vector<8x16xf32>
    %341 = vector.broadcast %328 : vector<8x1xf32> to vector<8x16xf32>
    %342 = vector.broadcast %336 : vector<1x16xf32> to vector<8x16xf32>
    %343 = arith.mulf %341, %342 : vector<8x16xf32>
    %344 = arith.addf %340, %343 : vector<8x16xf32>
    %cst_47 = arith.constant dense<0.000000e+00> : vector<8x256xf32>
    %345 = tpu.matmul %320, %2, %cst_47 {dimension_numbers = #tpu.dot_dimension_numbers<[1], [0], [0], [1], [0, 0, 1, 1], [], []>} : vector<8x64xf32>, vector<64x256xf32>, vector<8x256xf32> -> vector<8x256xf32>
    %346 = arith.addf %345, %5 : vector<8x256xf32>
    %347 = math.tanh %346 : vector<8x256xf32>
    %348 = vector.broadcast %14 : vector<1x256xf32> to vector<8x256xf32>
    %349 = arith.mulf %347, %348 : vector<8x256xf32>
    %350 = vector.broadcast %17 : vector<1x256xf32> to vector<8x256xf32>
    %351 = arith.addf %349, %350 : vector<8x256xf32>
    %352 = vector.extract_strided_slice %351 {offsets = [0, 0], sizes = [8, 64], strides = [1, 1]} : vector<8x256xf32> to vector<8x64xf32>
    %353 = vector.extract_strided_slice %351 {offsets = [0, 64], sizes = [8, 64], strides = [1, 1]} : vector<8x256xf32> to vector<8x64xf32>
    %354 = vector.extract_strided_slice %351 {offsets = [0, 128], sizes = [8, 64], strides = [1, 1]} : vector<8x256xf32> to vector<8x64xf32>
    %355 = vector.extract_strided_slice %351 {offsets = [0, 192], sizes = [8, 64], strides = [1, 1]} : vector<8x256xf32> to vector<8x64xf32>
    %356 = arith.mulf %353, %318 : vector<8x64xf32>
    %357 = arith.mulf %352, %354 : vector<8x64xf32>
    %358 = arith.addf %356, %357 : vector<8x64xf32>
    %359 = math.tanh %358 : vector<8x64xf32>
    %360 = arith.mulf %355, %359 : vector<8x64xf32>
    %361 = vector.broadcast %3 : vector<1x64xf32> to vector<8x64xf32>
    %362 = arith.mulf %360, %361 : vector<8x64xf32>
    %cst_48 = arith.constant dense<0.000000e+00> : vector<8xf32>
    %363 = vector.multi_reduction <add>, %362, %cst_48 [1] : vector<8x64xf32> to vector<8xf32>
    %364 = vector.shape_cast %363 : vector<8xf32> to vector<8x1xf32>
    %365 = vector.broadcast %4 : vector<1x64xf32> to vector<8x64xf32>
    %366 = arith.mulf %360, %365 : vector<8x64xf32>
    %cst_49 = arith.constant dense<0.000000e+00> : vector<8xf32>
    %367 = vector.multi_reduction <add>, %366, %cst_49 [1] : vector<8x64xf32> to vector<8xf32>
    %368 = vector.shape_cast %367 : vector<8xf32> to vector<8x1xf32>
    %c8_i32_50 = arith.constant 8 : i32
    %369 = vector.broadcast %c8_i32_50 : i32 to vector<1x16xi32>
    %370 = arith.cmpi eq, %18, %369 : vector<1x16xi32>
    %371 = arith.extui %370 : vector<1x16xi1> to vector<1x16xi32>
    %372 = arith.sitofp %371 : vector<1x16xi32> to vector<1x16xf32>
    %c1_i32_51 = arith.constant 1 : i32
    %373 = vector.broadcast %c1_i32_51 : i32 to vector<1x16xi32>
    %374 = arith.cmpi eq, %18, %373 : vector<1x16xi32>
    %375 = arith.extui %374 : vector<1x16xi1> to vector<1x16xi32>
    %376 = arith.sitofp %375 : vector<1x16xi32> to vector<1x16xf32>
    %377 = vector.broadcast %364 : vector<8x1xf32> to vector<8x16xf32>
    %378 = vector.broadcast %372 : vector<1x16xf32> to vector<8x16xf32>
    %379 = arith.mulf %377, %378 : vector<8x16xf32>
    %380 = arith.addf %344, %379 : vector<8x16xf32>
    %381 = vector.broadcast %368 : vector<8x1xf32> to vector<8x16xf32>
    %382 = vector.broadcast %376 : vector<1x16xf32> to vector<8x16xf32>
    %383 = arith.mulf %381, %382 : vector<8x16xf32>
    %384 = arith.addf %380, %383 : vector<8x16xf32>
    %cst_52 = arith.constant dense<0.000000e+00> : vector<8x256xf32>
    %385 = tpu.matmul %360, %2, %cst_52 {dimension_numbers = #tpu.dot_dimension_numbers<[1], [0], [0], [1], [0, 0, 1, 1], [], []>} : vector<8x64xf32>, vector<64x256xf32>, vector<8x256xf32> -> vector<8x256xf32>
    %386 = arith.addf %385, %5 : vector<8x256xf32>
    %387 = math.tanh %386 : vector<8x256xf32>
    %388 = vector.broadcast %14 : vector<1x256xf32> to vector<8x256xf32>
    %389 = arith.mulf %387, %388 : vector<8x256xf32>
    %390 = vector.broadcast %17 : vector<1x256xf32> to vector<8x256xf32>
    %391 = arith.addf %389, %390 : vector<8x256xf32>
    %392 = vector.extract_strided_slice %391 {offsets = [0, 0], sizes = [8, 64], strides = [1, 1]} : vector<8x256xf32> to vector<8x64xf32>
    %393 = vector.extract_strided_slice %391 {offsets = [0, 64], sizes = [8, 64], strides = [1, 1]} : vector<8x256xf32> to vector<8x64xf32>
    %394 = vector.extract_strided_slice %391 {offsets = [0, 128], sizes = [8, 64], strides = [1, 1]} : vector<8x256xf32> to vector<8x64xf32>
    %395 = vector.extract_strided_slice %391 {offsets = [0, 192], sizes = [8, 64], strides = [1, 1]} : vector<8x256xf32> to vector<8x64xf32>
    %396 = arith.mulf %393, %358 : vector<8x64xf32>
    %397 = arith.mulf %392, %394 : vector<8x64xf32>
    %398 = arith.addf %396, %397 : vector<8x64xf32>
    %399 = math.tanh %398 : vector<8x64xf32>
    %400 = arith.mulf %395, %399 : vector<8x64xf32>
    %401 = vector.broadcast %3 : vector<1x64xf32> to vector<8x64xf32>
    %402 = arith.mulf %400, %401 : vector<8x64xf32>
    %cst_53 = arith.constant dense<0.000000e+00> : vector<8xf32>
    %403 = vector.multi_reduction <add>, %402, %cst_53 [1] : vector<8x64xf32> to vector<8xf32>
    %404 = vector.shape_cast %403 : vector<8xf32> to vector<8x1xf32>
    %405 = vector.broadcast %4 : vector<1x64xf32> to vector<8x64xf32>
    %406 = arith.mulf %400, %405 : vector<8x64xf32>
    %cst_54 = arith.constant dense<0.000000e+00> : vector<8xf32>
    %407 = vector.multi_reduction <add>, %406, %cst_54 [1] : vector<8x64xf32> to vector<8xf32>
    %408 = vector.shape_cast %407 : vector<8xf32> to vector<8x1xf32>
    %c9_i32_55 = arith.constant 9 : i32
    %409 = vector.broadcast %c9_i32_55 : i32 to vector<1x16xi32>
    %410 = arith.cmpi eq, %18, %409 : vector<1x16xi32>
    %411 = arith.extui %410 : vector<1x16xi1> to vector<1x16xi32>
    %412 = arith.sitofp %411 : vector<1x16xi32> to vector<1x16xf32>
    %c0_i32_56 = arith.constant 0 : i32
    %413 = vector.broadcast %c0_i32_56 : i32 to vector<1x16xi32>
    %414 = arith.cmpi eq, %18, %413 : vector<1x16xi32>
    %415 = arith.extui %414 : vector<1x16xi1> to vector<1x16xi32>
    %416 = arith.sitofp %415 : vector<1x16xi32> to vector<1x16xf32>
    %417 = vector.broadcast %404 : vector<8x1xf32> to vector<8x16xf32>
    %418 = vector.broadcast %412 : vector<1x16xf32> to vector<8x16xf32>
    %419 = arith.mulf %417, %418 : vector<8x16xf32>
    %420 = arith.addf %384, %419 : vector<8x16xf32>
    %421 = vector.broadcast %408 : vector<8x1xf32> to vector<8x16xf32>
    %422 = vector.broadcast %416 : vector<1x16xf32> to vector<8x16xf32>
    %423 = arith.mulf %421, %422 : vector<8x16xf32>
    %424 = arith.addf %420, %423 : vector<8x16xf32>
    %c0_57 = arith.constant 0 : index
    %c0_58 = arith.constant 0 : index
    %425 = vector.load %arg6[%c0_57, %c0_58] : memref<8x16xf32, #tpu.memory_space<vmem>>, vector<8x16xf32>
    tpu.vector_store %arg6[%c0_57, %c0_58], %424 {strides = array<i32>} : memref<8x16xf32, #tpu.memory_space<vmem>>, vector<8x16xf32>,
    return
  }
  func.func @transform_0(%arg0: i32) -> (i32, i32) {
    %c0_i32 = arith.constant 0 : i32
    %c0_i32_0 = arith.constant 0 : i32
    return %arg0, %c0_i32 : i32, i32
  }
  func.func @transform_1(%arg0: i32) -> (i32, i32) {
    %c0_i32 = arith.constant 0 : i32
    %c0_i32_0 = arith.constant 0 : i32
    %c0_i32_1 = arith.constant 0 : i32
    return %c0_i32, %c0_i32_0 : i32, i32
  }
  func.func @transform_2(%arg0: i32) -> (i32, i32) {
    %c0_i32 = arith.constant 0 : i32
    %c0_i32_0 = arith.constant 0 : i32
    %c0_i32_1 = arith.constant 0 : i32
    return %c0_i32, %c0_i32_0 : i32, i32
  }
  func.func @transform_3(%arg0: i32) -> (i32, i32) {
    %c0_i32 = arith.constant 0 : i32
    %c0_i32_0 = arith.constant 0 : i32
    %c0_i32_1 = arith.constant 0 : i32
    return %c0_i32, %c0_i32_0 : i32, i32
  }
  func.func @transform_4(%arg0: i32) -> (i32, i32) {
    %c0_i32 = arith.constant 0 : i32
    %c0_i32_0 = arith.constant 0 : i32
    %c0_i32_1 = arith.constant 0 : i32
    return %c0_i32, %c0_i32_0 : i32, i32
  }
  func.func @transform_5(%arg0: i32) -> (i32, i32) {
    %c0_i32 = arith.constant 0 : i32
    %c0_i32_0 = arith.constant 0 : i32
    return %arg0, %c0_i32 : i32, i32
  }
}

</mosaic_0001>

<bundles_post_ra>
// kernel: decoder_forward.1
= control target key start
LH: loop header
LB: loop body
LE: loop exit
PB: predicated region body
PF: predicated region fallthrough
CT: control target
= control target key end

     0   :  { %10 = vsyncpa [#allocation3], 0  ;;  %s1647_s0 = inlined_call_operand.vmem [shape: f32[8,32], index: 0, kind: input, shape index: {}]   ;;  %s1648_s1 = inlined_call_operand.hbm [shape: f32[32,256], index: 1, kind: input, shape index: {}]   ;;  %s1649_s2 = inlined_call_operand.hbm [shape: f32[64,256], index: 2, kind: input, shape index: {}]   ;;  %s1650_s3 = inlined_call_operand.vmem [shape: f32[2,64], index: 3, kind: input, shape index: {}]   ;;  %s1651_s4 = inlined_call_operand.vmem [shape: f32[1,16], index: 4, kind: input, shape index: {}]   ;;  %s1652_s5 = inlined_call_operand.vmem [shape: f32[8,16], index: 5, kind: output, shape index: {}]  }
   0x1   :  { %s18_s20 = sshll.u32 %s1648_s1, 4  ;;  %s19_s20 = int_to_ptr.hbm [resolvable:$true] %s18_s20 }
   0x2   :  { %11 = vsyncpa [#allocation5], 0  ;;  %s1140_s21 = smov [#allocation2]   ;;  %s31_s25 = sshll.u32 %s1649_s2, 4  ;;  %s32_s25 = int_to_ptr.hbm [resolvable:$true] %s31_s25 }
   0x3   :  { %s20_s22 = sshll.u32 %s1140_s21, 4  ;;  %s1141_s26 = smov 256   ;;  %s21_s22 = int_to_ptr.vmem [resolvable:$true] %s20_s22 }
   0x4   :  { %s1142_s27 = smov 16   ;;  %s1143_s28 = smov [#allocation4]  }
   0x5   :  { %26 = dma.hbm_to_vmem [thread:$0]  %s19_s20, 1024, %s21_s22, [#allocation3], %s1141_s26, %s1141_s26, %s1142_s27  }
   0x6   :  { %s33_s29 = sshll.u32 %s1143_s28, 4  ;;  %s34_s29 = int_to_ptr.vmem [resolvable:$true] %s33_s29 }
   0x7   :  { %39 = dma.hbm_to_vmem [thread:$0]  %s32_s25, 2048, %s34_s29, [#allocation5], %s1141_s26, %s1141_s26, %s1142_s27  }
   0x8   :  { %1136 = dma.done.wait [#allocation3], 1024  }
   0x9   :  { %1137 = vsyncadd [#allocation3], 4294966272 }
   0xa   :  { %1138 = dma.done.wait [#allocation5], 2048  }
   0xb   :  { %1139 = vsyncadd [#allocation5], 4294965248  ;;  %v1183_v0 = vld [vmem:[#allocation4 + $0x70] sm:$0xff]  ;;  %v1185_v1 = vld [vmem:[#allocation4 + $0x78] sm:$0xff]  ;;  %vm79_vm0 = vcmask 261120   ;;  %v1144_v25 = vmov 0.0   ;;  %v123_v26 = vlaneseq }
   0xc   :  { %v1187_v2 = vld [vmem:[#allocation4 + $0x60] sm:$0xff]  ;;  %153 = vmatpush.msra.mxu2 %v1183_v0  ;;  %173 = vmatpush.msra.mxu3 %v1185_v1  ;;  %v1191_v3 = vld [vmem:[#allocation4 + $0x68] sm:$0xff]  ;;  %v1193_v4 = vld [vmem:[#allocation4 + $0x50] sm:$0xff]  ;;  %v1145_v35 = vmov 0.5   ;;  %vm141_vm2 = vcmask 523264   ;;  %vm980_vm13 = vcmask 130048  }
   0xd   :  { %v1195_v5 = vld [vmem:[#allocation4 + $0x58] sm:$0xff]  ;;  %v1199_v6 = vld [vmem:[#allocation4 + $0x40] sm:$0xff]  ;;  %v1201_v7 = vld [vmem:[#allocation4 + $0x48] sm:$0xff]  ;;  %v1300_v27 = vand.u32 127, %v123_v26 }
   0xe   :  { %154 = vmatpush.msra.mxu2 %v1187_v2  ;;  %174 = vmatpush.msra.mxu3 %v1191_v3  ;;  %v59_v8 = vld [vmem:[#allocation2 + $0x30] sm:$0xff]  ;;  %v60_v10 = vld [vmem:[#allocation2 + $0x38] sm:$0xff]  ;;  %v57_v12 = vld [vmem:[#allocation2 + $0x20] sm:$0xff] }
   0xf   :  { %v1205_v9 = vld [vmem:[#allocation4 + $0x30] sm:$0xff]  ;;  %v1207_v11 = vld [vmem:[#allocation4 + $0x38] sm:$0xff]  ;;  %95 = vmatpush.msra.mxu0 %v59_v8  ;;  %115 = vmatpush.msra.mxu1 %v60_v10  ;;  %v58_v13 = vld [vmem:[#allocation2 + $0x28] sm:$0xff]  ;;  %v125_v34 = vadd.s32 128, %v1300_v27  ;;  %vm226_vm3 = vcmp.eq.s32.totalorder %v1300_v27, 0  ;;  %vm229_vm4 = vcmp.eq.s32.totalorder %v1300_v27, 9 }
  0x10   :  { %155 = vmatpush.msra.mxu2 %v1193_v4  ;;  %175 = vmatpush.msra.mxu3 %v1195_v5  ;;  %v1211_v14 = vld [vmem:[#allocation4 + $0x20] sm:$0xff]  ;;  %v55_v15 = vld [vmem:[#allocation2 + $0x10] sm:$0xff]  ;;  %v56_v16 = vld [vmem:[#allocation2 + $0x18] sm:$0xff]  ;;  %vm312_vm5 = vcmp.eq.s32.totalorder %v1300_v27, 1  ;;  %vm315_vm6 = vcmp.eq.s32.totalorder %v1300_v27, 8  ;;  %vm398_vm7 = vcmp.eq.s32.totalorder %v1300_v27, 2 }
  0x11   :  { %v1213_v17 = vld [vmem:[#allocation4 + $0x28] sm:$0xff]  ;;  %96 = vmatpush.msra.mxu0 %v57_v12  ;;  %116 = vmatpush.msra.mxu1 %v58_v13  ;;  %v53_v18 = vld [vmem:[#allocation2] sm:$0xff]  ;;  %v1217_v20 = vld [vmem:[#allocation4 + $0x10] sm:$0xff]  ;;  %vm129_vm1 = vcmp.lt.s32.totalorder %v125_v34, 192  ;;  %vm401_vm8 = vcmp.eq.s32.totalorder %v1300_v27, 7  ;;  %vm484_vm9 = vcmp.eq.s32.totalorder %v1300_v27, 3 }
  0x12   :  { %156 = vmatpush.msra.mxu2 %v1199_v6  ;;  %176 = vmatpush.msra.mxu3 %v1201_v7  ;;  %v54_v19 = vld [vmem:[#allocation2 + $0x8] sm:$0xff]  ;;  %v1219_v21 = vld [vmem:[#allocation4 + $0x18] sm:$0xff]  ;;  %v52_v22 = vld [vmem:[%s1647_s0] sm:$0xff]  ;;  %v1309_v36 = vsel %vm129_vm1, 1.0, %v1145_v35  ;;  %v1311_v40 = vsel %vm129_vm1, 0.0, %v1145_v35  ;;  %s1146_s0 = smov 64  }
  0x13   :  { %97 = vmatpush.msra.mxu0 %v55_v15  ;;  %117 = vmatpush.msra.mxu1 %v56_v16  ;;  %v1226_v23 = vld [vmem:[#allocation4] sm:$0xff]  ;;  %v1228_v24 = vld [vmem:[#allocation4 + $0x8] sm:$0xff]  ;;  %vm487_vm10 = vcmp.eq.s32.totalorder %v1300_v27, 6  ;;  %vm570_vm11 = vcmp.eq.s32.totalorder %v1300_v27, 4  ;;  %vm573_vm12 = vcmp.eq.s32.totalorder %v1300_v27, 5 }
  0x14   :  { %157 = vmatpush.msra.mxu2 %v1205_v9  ;;  %177 = vmatpush.msra.mxu3 %v1207_v11 }
  0x15   :  { %98 = vmatpush.msra.mxu0 %v53_v18  ;;  %118 = vmatpush.msra.mxu1 %v54_v19 }
  0x16   :  { %158 = vmatpush.msra.mxu2 %v1211_v14  ;;  %178 = vmatpush.msra.mxu3 %v1213_v17 }
  0x17   :  { %988 = vmatmul.msk.f32.vlgmr.msra.gmra.mxu0 %vm79_vm0, %v52_v22  ;;  %989 = vmatmul.msk.f32.vlgmr.msra.gmra.mxu1 %vm79_vm0, %v52_v22 }
  0x18   :  { %159 = vmatpush.msra.mxu2 %v1217_v20  ;;  %179 = vmatpush.msra.mxu3 %v1219_v21 }
  0x19   :  { %249 = vmatpush.msrb.mxu0 %v1183_v0  ;;  %269 = vmatpush.msrb.mxu1 %v1185_v1 }
  0x1a   :  { %160 = vmatpush.msra.mxu2 %v1226_v23  ;;  %180 = vmatpush.msra.mxu3 %v1228_v24 }
  0x1b   :  { %161 = vmatmul.f32.vlgmr.msra.gmra.mxu2 %v1144_v25  ;;  %181 = vmatmul.f32.vlgmr.msra.gmra.mxu3 %v1144_v25 }
  0x1c   :  { %335 = vmatpush.msrb.mxu2 %v1183_v0  ;;  %355 = vmatpush.msrb.mxu3 %v1185_v1 }
  0x1d   :  { %250 = vmatpush.msrb.mxu0 %v1187_v2  ;;  %270 = vmatpush.msrb.mxu1 %v1191_v3 }
  0x1e   :  { %336 = vmatpush.msrb.mxu2 %v1187_v2  ;;  %356 = vmatpush.msrb.mxu3 %v1191_v3 }
  0x1f   :  { %251 = vmatpush.msrb.mxu0 %v1193_v4  ;;  %271 = vmatpush.msrb.mxu1 %v1195_v5 }
  0x20   :  { %337 = vmatpush.msrb.mxu2 %v1193_v4  ;;  %357 = vmatpush.msrb.mxu3 %v1195_v5 }
  0x21   :  { %252 = vmatpush.msrb.mxu0 %v1199_v6  ;;  %272 = vmatpush.msrb.mxu1 %v1201_v7 }
  0x22   :  { %338 = vmatpush.msrb.mxu2 %v1199_v6  ;;  %358 = vmatpush.msrb.mxu3 %v1201_v7 }
  0x23   :  { %253 = vmatpush.msrb.mxu0 %v1205_v9  ;;  %273 = vmatpush.msrb.mxu1 %v1207_v11 }
  0x24   :  { %339 = vmatpush.msrb.mxu2 %v1205_v9  ;;  %359 = vmatpush.msrb.mxu3 %v1207_v11 }
  0x25   :  { %254 = vmatpush.msrb.mxu0 %v1211_v14  ;;  %274 = vmatpush.msrb.mxu1 %v1213_v17 }
  0x26   :  { %340 = vmatpush.msrb.mxu2 %v1211_v14  ;;  %360 = vmatpush.msrb.mxu3 %v1213_v17 }
  0x27   :  { %255 = vmatpush.msrb.mxu0 %v1217_v20  ;;  %275 = vmatpush.msrb.mxu1 %v1219_v21 }
  0x28   :  { %341 = vmatpush.msrb.mxu2 %v1217_v20  ;;  %361 = vmatpush.msrb.mxu3 %v1219_v21 }
  0x29   :  { %256 = vmatpush.msrb.mxu0 %v1226_v23  ;;  %276 = vmatpush.msrb.mxu1 %v1228_v24 }
  0x2a   :  { %342 = vmatpush.msrb.mxu2 %v1226_v23  ;;  %362 = vmatpush.msrb.mxu3 %v1228_v24 }
  0x2b   :  { %421 = vmatpush.msra.mxu0 %v1183_v0  ;;  %441 = vmatpush.msra.mxu1 %v1185_v1 }
  0x2c   :  { %507 = vmatpush.msra.mxu2 %v1183_v0  ;;  %527 = vmatpush.msra.mxu3 %v1185_v1 }
  0x2d   :  { %422 = vmatpush.msra.mxu0 %v1187_v2  ;;  %442 = vmatpush.msra.mxu1 %v1191_v3 }
  0x2e   :  { %508 = vmatpush.msra.mxu2 %v1187_v2  ;;  %528 = vmatpush.msra.mxu3 %v1191_v3 }
  0x2f   :  { %423 = vmatpush.msra.mxu0 %v1193_v4  ;;  %443 = vmatpush.msra.mxu1 %v1195_v5 }
  0x30   :  { %509 = vmatpush.msra.mxu2 %v1193_v4  ;;  %529 = vmatpush.msra.mxu3 %v1195_v5 }
  0x31   :  { %424 = vmatpush.msra.mxu0 %v1199_v6  ;;  %444 = vmatpush.msra.mxu1 %v1201_v7 }
  0x32   :  { %510 = vmatpush.msra.mxu2 %v1199_v6  ;;  %530 = vmatpush.msra.mxu3 %v1201_v7 }
  0x33   :  { %425 = vmatpush.msra.mxu0 %v1205_v9  ;;  %445 = vmatpush.msra.mxu1 %v1207_v11 }
  0x34   :  { %511 = vmatpush.msra.mxu2 %v1205_v9  ;;  %531 = vmatpush.msra.mxu3 %v1207_v11 }
  0x35   :  { %426 = vmatpush.msra.mxu0 %v1211_v14  ;;  %446 = vmatpush.msra.mxu1 %v1213_v17 }
  0x36   :  { %512 = vmatpush.msra.mxu2 %v1211_v14  ;;  %532 = vmatpush.msra.mxu3 %v1213_v17 }
  0x37   :  { %427 = vmatpush.msra.mxu0 %v1217_v20  ;;  %447 = vmatpush.msra.mxu1 %v1219_v21 }
  0x38   :  { %513 = vmatpush.msra.mxu2 %v1217_v20  ;;  %533 = vmatpush.msra.mxu3 %v1219_v21 }
  0x39   :  { %428 = vmatpush.msra.mxu0 %v1226_v23  ;;  %448 = vmatpush.msra.mxu1 %v1228_v24 }
  0x3a   :  { %514 = vmatpush.msra.mxu2 %v1226_v23  ;;  %534 = vmatpush.msra.mxu3 %v1228_v24 }
  0x94   :  { %v1302_v28 = vpop.f32.mrf.mxu0  ;;  %v1304_v29 = vpop.f32.mrf.mxu1 }
  0x9e   :  { %v162_v30 = vpop.f32.mrf.mxu2  ;;  %v182_v31 = vpop.f32.mrf.mxu3 }
  0x9f   :  { %v163_v32 = vadd.f32 %v162_v30, %v1302_v28  ;;  %v183_v33 = vadd.f32 %v182_v31, %v1304_v29 }
  0xa1   :  { %1028 = vtanh.f32 %v163_v32 }
  0xa2   :  { %1030 = vtanh.f32 %v183_v33 }
  0xa7   :  { %v1029_v37 = vpop.eup %1028 }
  0xa8   :  { %v1031_v38 = vpop.eup %1030  ;;  %v187_v39 = vmul.f32 0.5, %v1029_v37 }
  0xa9   :  { %v188_v41 = vmul.f32 %v1031_v38, %v1309_v36 }
  0xaa   :  { %v189_v42 = vadd.f32 0.5, %v187_v39 }
  0xab   :  { %v190_v43 = vadd.f32 %v188_v41, %v1311_v40 }
  0xac   :  { %v191_v45 = vmul.f32 0.0, %v189_v42 }
  0xad   :  { %v192_v44 = vmul.f32 %v190_v43, %v189_v42 }
  0xaf   :  { %194 = vrot.lane.b32.xlu0 %v192_v44, %s1146_s0 }
 0x121   :  { %v195_v46 = vpop.permute.xlu0 %194 }
 0x122   :  { %v197_v47 = vadd.f32 %v195_v46, %v191_v45 }
 0x124   :  { %1032 = vtanh.f32 %v197_v47 }
 0x12a   :  { %v1033_v48 = vpop.eup %1032 }
 0x12b   :  { %v1316_v49 = vmul.f32 %v1033_v48, %v190_v43 }
 0x12d   :  { %237 = vrot.lane.b32.xlu0 %v1316_v49, %s1146_s0 }
 0x19f   :  { %v238_v50 = vpop.permute.xlu0 %237 }
 0x1a0   :  { %992 = vmatmul.msk.f32.vlgmr.msrb.gmra.mxu0 %vm141_vm2, %v238_v50  ;;  %993 = vmatmul.msk.f32.vlgmr.msrb.gmra.mxu1 %vm141_vm2, %v238_v50 }
 0x1a1   :  { %593 = vmatpush.msrb.mxu0 %v1183_v0  ;;  %613 = vmatpush.msrb.mxu1 %v1185_v1 }
 0x1a3   :  { %594 = vmatpush.msrb.mxu0 %v1187_v2  ;;  %614 = vmatpush.msrb.mxu1 %v1191_v3 }
 0x1a5   :  { %595 = vmatpush.msrb.mxu0 %v1193_v4  ;;  %615 = vmatpush.msrb.mxu1 %v1195_v5 }
 0x1a7   :  { %596 = vmatpush.msrb.mxu0 %v1199_v6  ;;  %616 = vmatpush.msrb.mxu1 %v1201_v7 }
 0x1a9   :  { %597 = vmatpush.msrb.mxu0 %v1205_v9  ;;  %617 = vmatpush.msrb.mxu1 %v1207_v11 }
 0x1ab   :  { %598 = vmatpush.msrb.mxu0 %v1211_v14  ;;  %618 = vmatpush.msrb.mxu1 %v1213_v17 }
 0x1ad   :  { %599 = vmatpush.msrb.mxu0 %v1217_v20  ;;  %619 = vmatpush.msrb.mxu1 %v1219_v21 }
 0x1af   :  { %600 = vmatpush.msrb.mxu0 %v1226_v23  ;;  %620 = vmatpush.msrb.mxu1 %v1228_v24 }
 0x21d   :  { %v258_v51 = vpop.f32.mrf.mxu0  ;;  %v278_v52 = vpop.f32.mrf.mxu1 }
 0x21e   :  { %v259_v53 = vadd.f32 %v258_v51, %v1302_v28  ;;  %v279_v54 = vadd.f32 %v278_v52, %v1304_v29 }
 0x220   :  { %1034 = vtanh.f32 %v259_v53 }
 0x221   :  { %1036 = vtanh.f32 %v279_v54 }
 0x226   :  { %v1035_v55 = vpop.eup %1034 }
 0x227   :  { %v1037_v56 = vpop.eup %1036  ;;  %v283_v57 = vmul.f32 0.5, %v1035_v55 }
 0x228   :  { %v284_v58 = vmul.f32 %v1037_v56, %v1309_v36 }
 0x229   :  { %v285_v59 = vadd.f32 0.5, %v283_v57 }
 0x22a   :  { %v286_v60 = vadd.f32 %v284_v58, %v1311_v40 }
 0x22b   :  { %v287_v62 = vmul.f32 %v285_v59, %v197_v47 }
 0x22c   :  { %v288_v61 = vmul.f32 %v286_v60, %v285_v59 }
 0x22e   :  { %290 = vrot.lane.b32.xlu1 %v288_v61, %s1146_s0 }
 0x2a0   :  { %v291_v63 = vpop.permute.xlu1 %290 }
 0x2a1   :  { %v293_v8 = vadd.f32 %v291_v63, %v287_v62 }
 0x2a3   :  { %1038 = vtanh.f32 %v293_v8 }
 0x2a9   :  { %v1039_v10 = vpop.eup %1038 }
 0x2aa   :  { %v1343_v12 = vmul.f32 %v1039_v10, %v286_v60 }
 0x2ac   :  { %323 = vrot.lane.b32.xlu1 %v1343_v12, %s1146_s0 }
 0x31e   :  { %v324_v13 = vpop.permute.xlu1 %323 }
 0x31f   :  { %996 = vmatmul.msk.f32.vlgmr.msrb.gmra.mxu2 %vm141_vm2, %v324_v13  ;;  %997 = vmatmul.msk.f32.vlgmr.msrb.gmra.mxu3 %vm141_vm2, %v324_v13 }
 0x320   :  { %673 = vmatpush.msrb.mxu2 %v1183_v0  ;;  %693 = vmatpush.msrb.mxu3 %v1185_v1 }
 0x322   :  { %674 = vmatpush.msrb.mxu2 %v1187_v2  ;;  %694 = vmatpush.msrb.mxu3 %v1191_v3 }
 0x324   :  { %675 = vmatpush.msrb.mxu2 %v1193_v4  ;;  %695 = vmatpush.msrb.mxu3 %v1195_v5 }
 0x326   :  { %676 = vmatpush.msrb.mxu2 %v1199_v6  ;;  %696 = vmatpush.msrb.mxu3 %v1201_v7 }
 0x328   :  { %677 = vmatpush.msrb.mxu2 %v1205_v9  ;;  %697 = vmatpush.msrb.mxu3 %v1207_v11 }
 0x32a   :  { %678 = vmatpush.msrb.mxu2 %v1211_v14  ;;  %698 = vmatpush.msrb.mxu3 %v1213_v17 }
 0x32c   :  { %679 = vmatpush.msrb.mxu2 %v1217_v20  ;;  %699 = vmatpush.msrb.mxu3 %v1219_v21 }
 0x32e   :  { %680 = vmatpush.msrb.mxu2 %v1226_v23  ;;  %700 = vmatpush.msrb.mxu3 %v1228_v24 }
 0x3a2   :  { %v344_v15 = vpop.f32.mrf.mxu2  ;;  %v364_v16 = vpop.f32.mrf.mxu3 }
 0x3a3   :  { %v345_v18 = vadd.f32 %v344_v15, %v1302_v28  ;;  %v365_v19 = vadd.f32 %v364_v16, %v1304_v29 }
 0x3a5   :  { %1040 = vtanh.f32 %v345_v18 }
 0x3a6   :  { %1042 = vtanh.f32 %v365_v19 }
 0x3ab   :  { %v1041_v22 = vpop.eup %1040 }
 0x3ac   :  { %v1043_v26 = vpop.eup %1042  ;;  %v369_v30 = vmul.f32 0.5, %v1041_v22 }
 0x3ad   :  { %v370_v31 = vmul.f32 %v1043_v26, %v1309_v36 }
 0x3ae   :  { %v371_v32 = vadd.f32 0.5, %v369_v30 }
 0x3af   :  { %v372_v33 = vadd.f32 %v370_v31, %v1311_v40 }
 0x3b0   :  { %v373_v35 = vmul.f32 %v371_v32, %v293_v8 }
 0x3b1   :  { %v374_v34 = vmul.f32 %v372_v33, %v371_v32 }
 0x3b3   :  { %376 = vrot.lane.b32.xlu2 %v374_v34, %s1146_s0 }
 0x40d   :  { %v377_v37 = vpop.permute.xlu2 %376 }
 0x40e   :  { %v379_v38 = vadd.f32 %v377_v37, %v373_v35 }
 0x410   :  { %1044 = vtanh.f32 %v379_v38 }
 0x416   :  { %v1045_v39 = vpop.eup %1044 }
 0x417   :  { %v1370_v41 = vmul.f32 %v1045_v39, %v372_v33 }
 0x419   :  { %409 = vrot.lane.b32.xlu2 %v1370_v41, %s1146_s0 }
 0x473   :  { %v410_v42 = vpop.permute.xlu2 %409 }
 0x474   :  { %1000 = vmatmul.msk.f32.vlgmr.msra.gmra.mxu0 %vm141_vm2, %v410_v42  ;;  %1001 = vmatmul.msk.f32.vlgmr.msra.gmra.mxu1 %vm141_vm2, %v410_v42 }
 0x475   :  { %753 = vmatpush.msra.mxu0 %v1183_v0  ;;  %773 = vmatpush.msra.mxu1 %v1185_v1 }
 0x477   :  { %754 = vmatpush.msra.mxu0 %v1187_v2  ;;  %774 = vmatpush.msra.mxu1 %v1191_v3 }
 0x479   :  { %755 = vmatpush.msra.mxu0 %v1193_v4  ;;  %775 = vmatpush.msra.mxu1 %v1195_v5 }
 0x47b   :  { %756 = vmatpush.msra.mxu0 %v1199_v6  ;;  %776 = vmatpush.msra.mxu1 %v1201_v7 }
 0x47d   :  { %757 = vmatpush.msra.mxu0 %v1205_v9  ;;  %777 = vmatpush.msra.mxu1 %v1207_v11 }
 0x47f   :  { %758 = vmatpush.msra.mxu0 %v1211_v14  ;;  %778 = vmatpush.msra.mxu1 %v1213_v17 }
 0x481   :  { %759 = vmatpush.msra.mxu0 %v1217_v20  ;;  %779 = vmatpush.msra.mxu1 %v1219_v21 }
 0x483   :  { %760 = vmatpush.msra.mxu0 %v1226_v23  ;;  %780 = vmatpush.msra.mxu1 %v1228_v24 }
 0x4f1   :  { %v430_v43 = vpop.f32.mrf.mxu0  ;;  %v450_v44 = vpop.f32.mrf.mxu1 }
 0x4f2   :  { %v431_v45 = vadd.f32 %v430_v43, %v1302_v28  ;;  %v451_v46 = vadd.f32 %v450_v44, %v1304_v29 }
 0x4f4   :  { %1046 = vtanh.f32 %v431_v45 }
 0x4f5   :  { %1048 = vtanh.f32 %v451_v46 }
 0x4fa   :  { %v1047_v47 = vpop.eup %1046 }
 0x4fb   :  { %v1049_v48 = vpop.eup %1048  ;;  %v455_v50 = vmul.f32 0.5, %v1047_v47 }
 0x4fc   :  { %v456_v51 = vmul.f32 %v1049_v48, %v1309_v36 }
 0x4fd   :  { %v457_v52 = vadd.f32 0.5, %v455_v50 }
 0x4fe   :  { %v458_v53 = vadd.f32 %v456_v51, %v1311_v40 }
 0x4ff   :  { %v459_v55 = vmul.f32 %v457_v52, %v379_v38 }
 0x500   :  { %v460_v54 = vmul.f32 %v458_v53, %v457_v52 }
 0x502   :  { %462 = vrot.lane.b32.xlu0 %v460_v54, %s1146_s0 }
 0x574   :  { %v463_v56 = vpop.permute.xlu0 %462 }
 0x575   :  { %v465_v57 = vadd.f32 %v463_v56, %v459_v55  ;;  %v1025_v56 = vld [vmem:[%s1650_s3] ss:$0 sm:$0xff] }
 0x577   :  { %1050 = vtanh.f32 %v465_v57 }
 0x57d   :  { %v1051_v58 = vpop.eup %1050 }
 0x57e   :  { %v1397_v59 = vmul.f32 %v1051_v58, %v458_v53 }
 0x580   :  { %495 = vrot.lane.b32.xlu1 %v1397_v59, %s1146_s0 }
 0x5f2   :  { %v496_v60 = vpop.permute.xlu1 %495 }
 0x5f3   :  { %1004 = vmatmul.msk.f32.vlgmr.msra.gmra.mxu2 %vm141_vm2, %v496_v60  ;;  %1005 = vmatmul.msk.f32.vlgmr.msra.gmra.mxu3 %vm141_vm2, %v496_v60 }
 0x5f4   :  { %833 = vmatpush.msra.mxu2 %v1183_v0  ;;  %853 = vmatpush.msra.mxu3 %v1185_v1 }
 0x5f6   :  { %834 = vmatpush.msra.mxu2 %v1187_v2  ;;  %854 = vmatpush.msra.mxu3 %v1191_v3 }
 0x5f8   :  { %835 = vmatpush.msra.mxu2 %v1193_v4  ;;  %855 = vmatpush.msra.mxu3 %v1195_v5 }
 0x5fa   :  { %836 = vmatpush.msra.mxu2 %v1199_v6  ;;  %856 = vmatpush.msra.mxu3 %v1201_v7 }
 0x5fc   :  { %837 = vmatpush.msra.mxu2 %v1205_v9  ;;  %857 = vmatpush.msra.mxu3 %v1207_v11 }
 0x5fe   :  { %838 = vmatpush.msra.mxu2 %v1211_v14  ;;  %858 = vmatpush.msra.mxu3 %v1213_v17 }
 0x600   :  { %839 = vmatpush.msra.mxu2 %v1217_v20  ;;  %859 = vmatpush.msra.mxu3 %v1219_v21 }
 0x602   :  { %840 = vmatpush.msra.mxu2 %v1226_v23  ;;  %860 = vmatpush.msra.mxu3 %v1228_v24 }
 0x676   :  { %v516_v61 = vpop.f32.mrf.mxu2  ;;  %v536_v62 = vpop.f32.mrf.mxu3 }
 0x677   :  { %v517_v63 = vadd.f32 %v516_v61, %v1302_v28  ;;  %v537_v8 = vadd.f32 %v536_v62, %v1304_v29 }
 0x679   :  { %1052 = vtanh.f32 %v517_v63 }
 0x67a   :  { %1054 = vtanh.f32 %v537_v8 }
 0x67f   :  { %v1053_v10 = vpop.eup %1052 }
 0x680   :  { %v1055_v13 = vpop.eup %1054  ;;  %v541_v15 = vmul.f32 0.5, %v1053_v10 }
 0x681   :  { %v542_v16 = vmul.f32 %v1055_v13, %v1309_v36 }
 0x682   :  { %v543_v18 = vadd.f32 0.5, %v541_v15 }
 0x683   :  { %v544_v19 = vadd.f32 %v542_v16, %v1311_v40 }
 0x684   :  { %v545_v26 = vmul.f32 %v543_v18, %v465_v57  ;;  %v1026_v57 = vld [vmem:[%s1650_s3 + $0x1] ss:$0 sm:$0xff] }
 0x685   :  { %v546_v22 = vmul.f32 %v544_v19, %v543_v18 }
 0x687   :  { %548 = vrot.lane.b32.xlu2 %v546_v22, %s1146_s0 }
 0x6e1   :  { %v549_v30 = vpop.permute.xlu2 %548 }
 0x6e2   :  { %v551_v31 = vadd.f32 %v549_v30, %v545_v26 }
 0x6e4   :  { %1056 = vtanh.f32 %v551_v31 }
 0x6ea   :  { %v1057_v32 = vpop.eup %1056 }
 0x6eb   :  { %v1424_v33 = vmul.f32 %v1057_v32, %v544_v19 }
 0x6ed   :  { %581 = vrot.lane.b32.xlu0 %v1424_v33, %s1146_s0 }
 0x75f   :  { %v582_v34 = vpop.permute.xlu0 %581 }
 0x760   :  { %1008 = vmatmul.msk.f32.vlgmr.msrb.gmra.mxu0 %vm141_vm2, %v582_v34  ;;  %1009 = vmatmul.msk.f32.vlgmr.msrb.gmra.mxu1 %vm141_vm2, %v582_v34 }
 0x761   :  { %913 = vmatpush.msrb.mxu0 %v1183_v0  ;;  %933 = vmatpush.msrb.mxu1 %v1185_v1 }
 0x763   :  { %914 = vmatpush.msrb.mxu0 %v1187_v2  ;;  %934 = vmatpush.msrb.mxu1 %v1191_v3 }
 0x765   :  { %915 = vmatpush.msrb.mxu0 %v1193_v4  ;;  %935 = vmatpush.msrb.mxu1 %v1195_v5 }
 0x767   :  { %916 = vmatpush.msrb.mxu0 %v1199_v6  ;;  %936 = vmatpush.msrb.mxu1 %v1201_v7 }
 0x769   :  { %917 = vmatpush.msrb.mxu0 %v1205_v9  ;;  %937 = vmatpush.msrb.mxu1 %v1207_v11 }
 0x76b   :  { %918 = vmatpush.msrb.mxu0 %v1211_v14  ;;  %938 = vmatpush.msrb.mxu1 %v1213_v17 }
 0x76d   :  { %919 = vmatpush.msrb.mxu0 %v1217_v20  ;;  %939 = vmatpush.msrb.mxu1 %v1219_v21 }
 0x76f   :  { %920 = vmatpush.msrb.mxu0 %v1226_v23  ;;  %940 = vmatpush.msrb.mxu1 %v1228_v24 }
 0x7dd   :  { %v602_v0 = vpop.f32.mrf.mxu0  ;;  %v622_v1 = vpop.f32.mrf.mxu1 }
 0x7de   :  { %v603_v2 = vadd.f32 %v602_v0, %v1302_v28  ;;  %v623_v3 = vadd.f32 %v622_v1, %v1304_v29 }
 0x7e0   :  { %1058 = vtanh.f32 %v603_v2 }
 0x7e1   :  { %1060 = vtanh.f32 %v623_v3 }
 0x7e6   :  { %v1059_v4 = vpop.eup %1058 }
 0x7e7   :  { %v1061_v5 = vpop.eup %1060  ;;  %v627_v6 = vmul.f32 0.5, %v1059_v4 }
 0x7e8   :  { %v628_v7 = vmul.f32 %v1061_v5, %v1309_v36 }
 0x7e9   :  { %v629_v9 = vadd.f32 0.5, %v627_v6 }
 0x7ea   :  { %v630_v11 = vadd.f32 %v628_v7, %v1311_v40 }
 0x7eb   :  { %v631_v17 = vmul.f32 %v629_v9, %v551_v31 }
 0x7ec   :  { %v632_v14 = vmul.f32 %v630_v11, %v629_v9 }
 0x7ee   :  { %634 = vrot.lane.b32.xlu1 %v632_v14, %s1146_s0 }
 0x860   :  { %v635_v20 = vpop.permute.xlu1 %634 }
 0x861   :  { %v637_v21 = vadd.f32 %v635_v20, %v631_v17 }
 0x863   :  { %1062 = vtanh.f32 %v637_v21 }
 0x869   :  { %v1063_v23 = vpop.eup %1062 }
 0x86a   :  { %v1451_v24 = vmul.f32 %v1063_v23, %v630_v11 }
 0x86c   :  { %661 = vrot.lane.b32.xlu2 %v1451_v24, %s1146_s0 }
 0x8c6   :  { %v662_v35 = vpop.permute.xlu2 %661 }
 0x8c7   :  { %1010 = vmatmul.msk.f32.vlgmr.msrb.gmra.mxu2 %vm141_vm2, %v662_v35  ;;  %1011 = vmatmul.msk.f32.vlgmr.msrb.gmra.mxu3 %vm141_vm2, %v662_v35 }
 0x94a   :  { %v682_v37 = vpop.f32.mrf.mxu2  ;;  %v702_v38 = vpop.f32.mrf.mxu3 }
 0x94b   :  { %v683_v39 = vadd.f32 %v682_v37, %v1302_v28  ;;  %v703_v42 = vadd.f32 %v702_v38, %v1304_v29 }
 0x94d   :  { %1064 = vtanh.f32 %v683_v39 }
 0x94e   :  { %1066 = vtanh.f32 %v703_v42 }
 0x953   :  { %v1065_v43 = vpop.eup %1064 }
 0x954   :  { %v1067_v44 = vpop.eup %1066  ;;  %v707_v45 = vmul.f32 0.5, %v1065_v43 }
 0x955   :  { %v708_v46 = vmul.f32 %v1067_v44, %v1309_v36 }
 0x956   :  { %v709_v47 = vadd.f32 0.5, %v707_v45 }
 0x957   :  { %v710_v48 = vadd.f32 %v708_v46, %v1311_v40 }
 0x958   :  { %v711_v51 = vmul.f32 %v709_v47, %v637_v21 }
 0x959   :  { %v712_v50 = vmul.f32 %v710_v48, %v709_v47 }
 0x95b   :  { %714 = vrot.lane.b32.xlu0 %v712_v50, %s1146_s0 }
 0x9cd   :  { %v715_v52 = vpop.permute.xlu0 %714 }
 0x9ce   :  { %v717_v53 = vadd.f32 %v715_v52, %v711_v51 }
 0x9d0   :  { %1068 = vtanh.f32 %v717_v53 }
 0x9d6   :  { %v1069_v54 = vpop.eup %1068 }
 0x9d7   :  { %v1462_v55 = vmul.f32 %v1069_v54, %v710_v48 }
 0x9d9   :  { %741 = vrot.lane.b32.xlu1 %v1462_v55, %s1146_s0 }
 0x9e1   :  { %202 = vrot.lane.b32.xlu1 %v1025_v56, %s1146_s0 }
 0x9e9   :  { %215 = vrot.lane.b32.xlu1 %v1026_v57, %s1146_s0 }
 0xa4b   :  { %v742_v58 = vpop.permute.xlu1 %741 }
 0xa4c   :  { %1012 = vmatmul.msk.f32.vlgmr.msra.gmra.mxu0 %vm141_vm2, %v742_v58  ;;  %1013 = vmatmul.msk.f32.vlgmr.msra.gmra.mxu1 %vm141_vm2, %v742_v58 }
 0xa53   :  { %v1481_v22 = vpop.permute.xlu1 %202 }
 0xa54   :  { %v205_v26 = vmul.f32 %v1481_v22, %v1316_v49  ;;  %v296_v32 = vmul.f32 %v1343_v12, %v1481_v22  ;;  %v382_v47 = vmul.f32 %v1370_v41, %v1481_v22  ;;  %v468_v50 = vmul.f32 %v1397_v59, %v1481_v22 }
 0xa5b   :  { %v1486_v30 = vpop.permute.xlu1 %215 }
 0xa5c   :  { %v218_v31 = vmul.f32 %v1486_v30, %v1316_v49  ;;  %v304_v9 = vmul.f32 %v1343_v12, %v1486_v30  ;;  %v390_v48 = vmul.f32 %v1370_v41, %v1486_v30 }
 0xac9   :  { %v762_v60 = vpop.f32.mrf.mxu0  ;;  %v782_v61 = vpop.f32.mrf.mxu1 }
 0xaca   :  { %v763_v62 = vadd.f32 %v762_v60, %v1302_v28  ;;  %v783_v63 = vadd.f32 %v782_v61, %v1304_v29 }
 0xacc   :  { %1070 = vtanh.f32 %v763_v62 }
 0xacd   :  { %1072 = vtanh.f32 %v783_v63 }
 0xad2   :  { %v1071_v8 = vpop.eup %1070 }
 0xad3   :  { %v1073_v10 = vpop.eup %1072  ;;  %v787_v13 = vmul.f32 0.5, %v1071_v8  ;;  %v476_v8 = vmul.f32 %v1397_v59, %v1486_v30 }
 0xad4   :  { %v788_v15 = vmul.f32 %v1073_v10, %v1309_v36  ;;  %v554_v10 = vmul.f32 %v1424_v33, %v1481_v22 }
 0xad5   :  { %v789_v16 = vadd.f32 0.5, %v787_v13 }
 0xad6   :  { %v790_v18 = vadd.f32 %v788_v15, %v1311_v40  ;;  %v1539_v15 = vsel %vm226_vm3, 1.0, %v1144_v25 }
 0xad7   :  { %v791_v34 = vmul.f32 %v789_v16, %v717_v53 }
 0xad8   :  { %v792_v19 = vmul.f32 %v790_v18, %v789_v16  ;;  %v1027_v16 = vld [vmem:[%s1651_s4] ss:$0 sm:$0xff] }
 0xada   :  { %794 = vrot.lane.b32.xlu2 %v792_v19, %s1146_s0 }
 0xae2   :  { %207 = vrot.lane.b32.xlu2 %v205_v26, %s1146_s0 }
 0xaea   :  { %220 = vrot.lane.b32.xlu2 %v218_v31, %s1146_s0 }
 0xaf2   :  { %298 = vrot.lane.b32.xlu2 %v296_v32, %s1146_s0  ;;  %v1553_v32 = vsel %vm312_vm5, 1.0, %v1144_v25 }
 0xb34   :  { %v795_v0 = vpop.permute.xlu2 %794 }
 0xb35   :  { %v797_v1 = vadd.f32 %v795_v0, %v791_v34  ;;  %v1556_v34 = vsel %vm315_vm6, 1.0, %v1144_v25 }
 0xb37   :  { %1074 = vtanh.f32 %v797_v1 }
 0xb3c   :  { %v208_v2 = vpop.permute.xlu2 %207 }
 0xb3d   :  { %v1075_v3 = vpop.eup %1074  ;;  %v210_v11 = vsel %vm141_vm2, %v208_v2, 0.0 }
 0xb3e   :  { %v1494_v4 = vmul.f32 %v1075_v3, %v790_v18  ;;  %v1547_v18 = vsel %vm229_vm4, 1.0, %v1144_v25  ;;  %v1562_v3 = vsel %vm398_vm7, 1.0, %v1144_v25 }
 0xb40   :  { %821 = vrot.lane.b32.xlu0 %v1494_v4, %s1146_s0 }
 0xb44   :  { %v221_v5 = vpop.permute.xlu2 %220 }
 0xb45   :  { %v223_v49 = vsel %vm141_vm2, %v221_v5, 0.0 }
 0xb46   :  { %224 = vadd.xlane.f32.xlu1 %v223_v49 }
 0xb4c   :  { %v299_v6 = vpop.permute.xlu2 %298 }
 0xb4d   :  { %v301_v7 = vsel %vm141_vm2, %v299_v6, 0.0 }
 0xb4e   :  { %302 = vadd.xlane.f32.xlu2 %v301_v7 }
 0xb5f   :  { %306 = vrot.lane.b32.xlu1 %v304_v9, %s1146_s0 }
 0xb6a   :  { %211 = vadd.xlane.f32.xlu0 %v210_v11  ;;  %v1567_v11 = vsel %vm401_vm8, 1.0, %v1144_v25 }
 0xbb2   :  { %v822_v14 = vpop.permute.xlu0 %821 }
 0xbb3   :  { %1014 = vmatmul.msk.f32.vlgmr.msra.gmra.mxu2 %vm141_vm2, %v822_v14  ;;  %1015 = vmatmul.msk.f32.vlgmr.msra.gmra.mxu3 %vm141_vm2, %v822_v14 }
 0xbb9   :  { %v225_v17 = vpop.xlane.xlu1 %224 }
 0xbba   :  { %v234_v31 = vmul.f32 %v1547_v18, %v225_v17 }
 0xbc1   :  { %v303_v13 = vpop.xlane.xlu2 %302 }
 0xbd1   :  { %v307_v20 = vpop.permute.xlu1 %306 }
 0xbd2   :  { %v309_v21 = vsel %vm141_vm2, %v307_v20, 0.0 }
 0xbd3   :  { %310 = vadd.xlane.f32.xlu2 %v309_v21 }
 0xbdd   :  { %v212_v51 = vpop.xlane.xlu0 %211 }
 0xbde   :  { %v232_v59 = vmul.f32 %v1539_v15, %v212_v51 }
 0xbe0   :  { %v233_v19 = vadd.f32 %v1027_v16, %v232_v59 }
 0xbe2   :  { %v235_v0 = vadd.f32 %v234_v31, %v233_v19 }
 0xc36   :  { %v842_v23 = vpop.f32.mrf.mxu2  ;;  %v862_v35 = vpop.f32.mrf.mxu3 }
 0xc37   :  { %v843_v37 = vadd.f32 %v842_v23, %v1302_v28  ;;  %v863_v12 = vadd.f32 %v862_v35, %v1304_v29 }
 0xc39   :  { %1076 = vtanh.f32 %v843_v37 }
 0xc3a   :  { %1078 = vtanh.f32 %v863_v12 }
 0xc3f   :  { %v1077_v38 = vpop.eup %1076 }
 0xc40   :  { %v1079_v39 = vpop.eup %1078  ;;  %v867_v42 = vmul.f32 0.5, %v1077_v38  ;;  %v640_v38 = vmul.f32 %v1451_v24, %v1481_v22 }
 0xc41   :  { %v868_v43 = vmul.f32 %v1079_v39, %v1309_v36  ;;  %v648_v39 = vmul.f32 %v1451_v24, %v1486_v30 }
 0xc42   :  { %v869_v44 = vadd.f32 0.5, %v867_v42  ;;  %v562_v42 = vmul.f32 %v1424_v33, %v1486_v30 }
 0xc43   :  { %v870_v45 = vadd.f32 %v868_v43, %v1311_v40  ;;  %v1585_v43 = vsel %vm484_vm9, 1.0, %v1144_v25 }
 0xc44   :  { %v871_v57 = vmul.f32 %v869_v44, %v797_v1  ;;  %v318_v1 = vmul.f32 %v1553_v32, %v303_v13 }
 0xc45   :  { %v872_v46 = vmul.f32 %v870_v45, %v869_v44 }
 0xc46   :  { %v311_v26 = vpop.xlane.xlu2 %310  ;;  %v319_v5 = vadd.f32 %v318_v1, %v235_v0 }
 0xc47   :  { %874 = vrot.lane.b32.xlu0 %v872_v46, %s1146_s0  ;;  %v320_v2 = vmul.f32 %v1556_v34, %v311_v26  ;;  %v1590_v46 = vsel %vm487_vm10, 1.0, %v1144_v25 }
 0xc49   :  { %v321_v6 = vadd.f32 %v320_v2, %v319_v5 }
 0xc4f   :  { %384 = vrot.lane.b32.xlu0 %v382_v47, %s1146_s0 }
 0xc57   :  { %392 = vrot.lane.b32.xlu0 %v390_v48, %s1146_s0 }
 0xc5f   :  { %470 = vrot.lane.b32.xlu0 %v468_v50, %s1146_s0 }
 0xcb9   :  { %v875_v52 = vpop.permute.xlu0 %874 }
 0xcba   :  { %v1523_v60 = vadd.f32 %v875_v52, %v871_v57  ;;  %v1006_v52 = vsel %vm570_vm11, 1.0, %v1144_v25 }
 0xcbc   :  { %1080 = vtanh.f32 %v1523_v60 }
 0xcc1   :  { %v385_v53 = vpop.permute.xlu0 %384 }
 0xcc2   :  { %v387_v54 = vsel %vm141_vm2, %v385_v53, 0.0  ;;  %v1081_v62 = vpop.eup %1080 }
 0xcc3   :  { %388 = vadd.xlane.f32.xlu2 %v387_v54  ;;  %v1527_v63 = vmul.f32 %v1081_v62, %v870_v45 }
 0xcc9   :  { %v393_v56 = vpop.permute.xlu0 %392 }
 0xcca   :  { %v395_v58 = vsel %vm141_vm2, %v393_v56, 0.0 }
 0xccb   :  { %396 = vadd.xlane.f32.xlu1 %v395_v58 }
 0xcd1   :  { %v471_v41 = vpop.permute.xlu0 %470 }
 0xcd2   :  { %v473_v61 = vsel %vm141_vm2, %v471_v41, 0.0 }
 0xcd3   :  { %474 = vadd.xlane.f32.xlu0 %v473_v61 }
 0xcdb   :  { %901 = vrot.lane.b32.xlu2 %v1527_v63, %s1146_s0 }
 0xce3   :  { %478 = vrot.lane.b32.xlu2 %v476_v8, %s1146_s0 }
 0xce4   :  { %556 = vrot.lane.b32.xlu1 %v554_v10, %s1146_s0 }
 0xd36   :  { %v389_v49 = vpop.xlane.xlu2 %388 }
 0xd37   :  { %v404_v7 = vmul.f32 %v1562_v3, %v389_v49 }
 0xd39   :  { %v405_v9 = vadd.f32 %v404_v7, %v321_v6 }
 0xd3e   :  { %v902_v14 = vpop.permute.xlu2 %901  ;;  %v397_v17 = vpop.xlane.xlu1 %396 }
 0xd3f   :  { %v406_v20 = vmul.f32 %v1567_v11, %v397_v17  ;;  %1016 = vmatmul.msk.f32.vlgmr.msrb.gmra.mxu0 %vm141_vm2, %v902_v14  ;;  %1017 = vmatmul.msk.f32.vlgmr.msrb.gmra.mxu1 %vm141_vm2, %v902_v14 }
 0xd41   :  { %v407_v21 = vadd.f32 %v406_v20, %v405_v9  ;;  %v1007_v9 = vsel %vm573_vm12, 1.0, %v1144_v25 }
 0xd46   :  { %v479_v23 = vpop.permute.xlu2 %478  ;;  %v475_v44 = vpop.xlane.xlu0 %474 }
 0xd47   :  { %v481_v35 = vsel %vm141_vm2, %v479_v23, 0.0  ;;  %v490_v45 = vmul.f32 %v1585_v43, %v475_v44 }
 0xd48   :  { %482 = vadd.xlane.f32.xlu2 %v481_v35 }
 0xd49   :  { %v491_v47 = vadd.f32 %v490_v45, %v407_v21 }
 0xd56   :  { %v557_v37 = vpop.permute.xlu1 %556 }
 0xd57   :  { %v559_v12 = vsel %vm141_vm2, %v557_v37, 0.0 }
 0xd58   :  { %560 = vadd.xlane.f32.xlu0 %v559_v12 }
 0xd60   :  { %642 = vrot.lane.b32.xlu2 %v640_v38, %s1146_s0 }
 0xd68   :  { %650 = vrot.lane.b32.xlu2 %v648_v39, %s1146_s0 }
 0xd6c   :  { %564 = vrot.lane.b32.xlu0 %v562_v42, %s1146_s0  ;;  %v728_v42 = vmul.f32 %v1462_v55, %v1486_v30 }
 0xdbb   :  { %v483_v24 = vpop.xlane.xlu2 %482 }
 0xdbc   :  { %v492_v48 = vmul.f32 %v1590_v46, %v483_v24  ;;  %v922_v53 = vpop.f32.mrf.mxu0  ;;  %v942_v54 = vpop.f32.mrf.mxu1  ;;  %v800_v24 = vmul.f32 %v1494_v4, %v1481_v22 }
 0xdbd   :  { %v923_v61 = vadd.f32 %v922_v53, %v1302_v28  ;;  %v943_v62 = vadd.f32 %v942_v54, %v1304_v29  ;;  %v808_v28 = vmul.f32 %v1494_v4, %v1486_v30  ;;  %v880_v29 = vmul.f32 %v1527_v63, %v1481_v22 }
 0xdbe   :  { %v493_v33 = vadd.f32 %v492_v48, %v491_v47 }
 0xdbf   :  { %1082 = vtanh.f32 %v923_v61 }
 0xdc0   :  { %1084 = vtanh.f32 %v943_v62 }
 0xdc3   :  { %v643_v50 = vpop.permute.xlu2 %642 }
 0xdc4   :  { %v645_v51 = vsel %vm141_vm2, %v643_v50, 0.0 }
 0xdc5   :  { %646 = vadd.xlane.f32.xlu0 %v645_v51  ;;  %v1083_v10 = vpop.eup %1082 }
 0xdc6   :  { %v1085_v13 = vpop.eup %1084  ;;  %v947_v16 = vmul.f32 0.5, %v1083_v10 }
 0xdc7   :  { %v948_v59 = vmul.f32 %v1085_v13, %v1309_v36  ;;  %v720_v36 = vmul.f32 %v1462_v55, %v1481_v22 }
 0xdc8   :  { %v949_v26 = vadd.f32 0.5, %v947_v16 }
 0xdc9   :  { %v950_v0 = vadd.f32 %v948_v59, %v1311_v40 }
 0xdca   :  { %v951_v2 = vmul.f32 %v949_v26, %v1523_v60 }
 0xdcb   :  { %v651_v56 = vpop.permute.xlu2 %650  ;;  %v561_v57 = vpop.xlane.xlu0 %560  ;;  %v952_v1 = vmul.f32 %v950_v0, %v949_v26 }
 0xdcc   :  { %v576_v58 = vmul.f32 %v1006_v52, %v561_v57  ;;  %v653_v41 = vsel %vm141_vm2, %v651_v56, 0.0 }
 0xdcd   :  { %654 = vadd.xlane.f32.xlu2 %v653_v41 }
 0xdce   :  { %v577_v8 = vadd.f32 %v576_v58, %v493_v33 }
 0xdde   :  { %v565_v19 = vpop.permute.xlu0 %564 }
 0xddf   :  { %v567_v31 = vsel %vm141_vm2, %v565_v19, 0.0 }
 0xde0   :  { %568 = vadd.xlane.f32.xlu1 %v567_v31 }
 0xde5   :  { %954 = vrot.lane.b32.xlu2 %v952_v1, %s1146_s0 }
 0xded   :  { %810 = vrot.lane.b32.xlu2 %v808_v28, %s1146_s0 }
 0xdf5   :  { %882 = vrot.lane.b32.xlu2 %v880_v29, %s1146_s0 }
 0xdf9   :  { %722 = vrot.lane.b32.xlu1 %v720_v36, %s1146_s0 }
 0xe38   :  { %v647_v14 = vpop.xlane.xlu0 %646 }
 0xe39   :  { %v656_v23 = vmul.f32 %v1007_v9, %v647_v14 }
 0xe40   :  { %v655_v40 = vpop.xlane.xlu2 %654 }
 0xe41   :  { %v658_v37 = vmul.f32 %v1006_v52, %v655_v40 }
 0xe48   :  { %v955_v5 = vpop.permute.xlu2 %954 }
 0xe49   :  { %v957_v49 = vadd.f32 %v955_v5, %v951_v2 }
 0xe4b   :  { %1086 = vtanh.f32 %v957_v49 }
 0xe50   :  { %v811_v25 = vpop.permute.xlu2 %810 }
 0xe51   :  { %v1087_v6 = vpop.eup %1086  ;;  %v813_v52 = vsel %vm141_vm2, %v811_v25, 0.0 }
 0xe52   :  { %v959_v7 = vmul.f32 %v1087_v6, %v950_v0 }
 0xe53   :  { %v569_v17 = vpop.xlane.xlu1 %568 }
 0xe54   :  { %v578_v20 = vmul.f32 %v1007_v9, %v569_v17  ;;  %v960_v21 = vmul.f32 %v959_v7, %v1481_v22  ;;  %v968_v38 = vmul.f32 %v959_v7, %v1486_v30  ;;  %v888_v22 = vmul.f32 %v1527_v63, %v1486_v30 }
 0xe56   :  { %v579_v35 = vadd.f32 %v578_v20, %v577_v8  ;;  %962 = vrot.lane.b32.xlu2 %v960_v21, %s1146_s0 }
 0xe58   :  { %v657_v60 = vadd.f32 %v656_v23, %v579_v35  ;;  %v883_v44 = vpop.permute.xlu2 %882 }
 0xe59   :  { %v885_v45 = vsel %vm141_vm2, %v883_v44, 0.0 }
 0xe5a   :  { %v659_v12 = vadd.f32 %v658_v37, %v657_v60 }
 0xe5e   :  { %970 = vrot.lane.b32.xlu2 %v968_v38, %s1146_s0 }
 0xe6b   :  { %v723_v27 = vpop.permute.xlu1 %722 }
 0xe6c   :  { %v725_v39 = vsel %vm141_vm2, %v723_v27, 0.0 }
 0xe6d   :  { %726 = vadd.xlane.f32.xlu0 %v725_v39 }
 0xe81   :  { %730 = vrot.lane.b32.xlu0 %v728_v42, %s1146_s0 }
 0xe87   :  { %886 = vadd.xlane.f32.xlu2 %v885_v45 }
 0xe89   :  { %802 = vrot.lane.b32.xlu0 %v800_v24, %s1146_s0 }
 0xeb0   :  { %v963_v4 = vpop.permute.xlu2 %962 }
 0xeb1   :  { %v965_v16 = vsel %vm141_vm2, %v963_v4, 0.0 }
 0xeb8   :  { %v971_v54 = vpop.permute.xlu2 %970 }
 0xee0   :  { %v727_v47 = vpop.xlane.xlu0 %726 }
 0xee1   :  { %v736_v48 = vmul.f32 %v1590_v46, %v727_v47  ;;  %v973_v46 = vsel %vm141_vm2, %v971_v54, 0.0 }
 0xee3   :  { %v737_v33 = vadd.f32 %v736_v48, %v659_v12 }
 0xef3   :  { %v731_v50 = vpop.permute.xlu0 %730 }
 0xef4   :  { %v733_v51 = vsel %vm141_vm2, %v731_v50, 0.0 }
 0xef5   :  { %734 = vadd.xlane.f32.xlu1 %v733_v51 }
 0xefa   :  { %v887_v19 = vpop.xlane.xlu2 %886 }
 0xefb   :  { %v803_v55 = vpop.permute.xlu0 %802 }
 0xefc   :  { %v805_v53 = vsel %vm141_vm2, %v803_v55, 0.0 }
 0xefd   :  { %814 = vadd.xlane.f32.xlu1 %v813_v52  ;;  %806 = vadd.xlane.f32.xlu0 %v805_v53 }
 0xf16   :  { %890 = vrot.lane.b32.xlu1 %v888_v22, %s1146_s0 }
 0xf40   :  { %974 = vadd.xlane.f32.xlu1 %v973_v46 }
 0xf68   :  { %v735_v56 = vpop.xlane.xlu1 %734 }
 0xf69   :  { %v738_v57 = vmul.f32 %v1585_v43, %v735_v56  ;;  %v896_v43 = vmul.f32 %v1556_v34, %v887_v19 }
 0xf6b   :  { %v739_v58 = vadd.f32 %v738_v57, %v737_v33 }
 0xf70   :  { %v815_v41 = vpop.xlane.xlu1 %814  ;;  %v807_v61 = vpop.xlane.xlu0 %806 }
 0xf71   :  { %v816_v62 = vmul.f32 %v1567_v11, %v807_v61  ;;  %v818_v8 = vmul.f32 %v1562_v3, %v815_v41 }
 0xf73   :  { %v817_v10 = vadd.f32 %v816_v62, %v739_v58 }
 0xf75   :  { %v819_v13 = vadd.f32 %v818_v8, %v817_v10 }
 0xf77   :  { %v897_v31 = vadd.f32 %v896_v43, %v819_v13 }
 0xf88   :  { %v891_v30 = vpop.permute.xlu1 %890 }
 0xf89   :  { %v893_v63 = vsel %vm141_vm2, %v891_v30, 0.0 }
 0xf8a   :  { %894 = vadd.xlane.f32.xlu0 %v893_v63 }
 0xf92   :  { %966 = vadd.xlane.f32.xlu0 %v965_v16 }
 0xfb3   :  { %v975_v0 = vpop.xlane.xlu1 %974 }
 0xfb4   :  { %v978_v28 = vmul.f32 %v1539_v15, %v975_v0 }
 0xffd   :  { %v895_v59 = vpop.xlane.xlu0 %894 }
 0xffe   :  { %v898_v26 = vmul.f32 %v1553_v32, %v895_v59 }
0x1000   :  { %v899_v1 = vadd.f32 %v898_v26, %v897_v31 }
0x1005   :  { %v967_v11 = vpop.xlane.xlu0 %966 }
0x1006   :  { %v976_v3 = vmul.f32 %v1547_v18, %v967_v11 }
0x1008   :  { %v977_v29 = vadd.f32 %v976_v3, %v899_v1 }
0x100a   :  { %v979_v36 = vadd.f32 %v978_v28, %v977_v29 }
0x100c   :  { %981 = vst.msk [vmem:[%s1652_s5] sm:$0xff] %vm980_vm13, %v979_v36 }
0x100d   :  { %986 = vsyncpa [#allocation3], 1 }
0x100e   :  { %987 = vsyncpa [#allocation5], 1 }

</bundles_post_ra>
